<compile_context>
chip_gen: v7x
topology: tpu7x:2x2x1
jax: 0.10.0
libtpu: 0.0.40
codegen_flags: <defaults>
</compile_context>

<pallas_src>
import numpy as np
import jax
import jax.numpy as jnp
from jax.experimental import pallas as pl
from jax.experimental.pallas import tpu as pltpu

H = W = 16
CIN = 3
COUT = 32
POOL = 4                 # 4x4 output cells
CELLS = POOL * POOL      # 16
HID = 64
NCLS = 10
KTAPS = 9 * CIN          # 27


# ---------------------------------------------------------------------------
# Single fused kernel: conv + bias + ReLU + avg-pool + flatten + MLP
# ---------------------------------------------------------------------------
def fused_forward_kernel(p_ref, wct_ref, bc_ref, poolt_ref,
                         w1r_ref, b1_ref, w2_ref, b2_ref, o_ref):
    # p_ref:     (1, 27, 256)   im2col patches for one batch elem (transposed)
    # wct_ref:   (32, 27)       conv weight, (cout, kh*9 + kw*3 + cin)
    # bc_ref:    (32, 1)        conv bias (column)
    # poolt_ref: (256, 16)      pooling matrix (includes the 1/16)
    # w1r_ref:   (32, 16, 64)   Linear1 weight reshaped (cout, cell, hidden)
    # b1_ref:    (1, 64)
    # w2_ref:    (64, 10)
    # b2_ref:    (1, 10)
    # o_ref:     (1, 1, 10)
    patches = p_ref[0]                                          # (27, 256)

    # conv + bias + ReLU (lane-dense: 256 spatial positions on lanes)
    conv = jnp.dot(wct_ref[...], patches,
                   preferred_element_type=jnp.float32)          # (32, 256)
    conv = jnp.maximum(conv + bc_ref[...], 0.0)

    # adaptive average pool 16x16 -> 4x4 as a single matmul
    pooled = jnp.dot(conv, poolt_ref[...],
                     preferred_element_type=jnp.float32)        # (32, 16)

    # flatten (c*16 + cell) fused with Linear(512 -> 64):
    #   h = b1 + sum_c pooled[c, :] @ w1r[c]
    # 32 unrolled tiny matmuls avoid any in-kernel reshape of pooled.
    h = b1_ref[...]                                             # (1, 64)
    for c in range(COUT):
        h = h + jnp.dot(pooled[c:c + 1, :], w1r_ref[c],
                        preferred_element_type=jnp.float32)     # (1,16)@(16,64)
    h = jnp.maximum(h, 0.0)

    # Linear(64 -> 10)
    logits = jnp.dot(h, w2_ref[...],
                     preferred_element_type=jnp.float32) + b2_ref[...]
    o_ref[0] = logits                                           # (1, 10)


# ---------------------------------------------------------------------------
# Trace-time constants / wrapper
# ---------------------------------------------------------------------------
def _pool_matrix():
    hh = np.arange(H)
    ww = np.arange(W)
    cell = (hh[:, None] // POOL) * POOL + (ww[None, :] // POOL)   # (16, 16)
    cell = cell.reshape(H * W)
    pool_t = (cell[:, None] == np.arange(CELLS)[None, :]).astype(np.float32)
    return jnp.asarray(pool_t / float((H // POOL) * (W // POOL)))  # (256, 16)


_POOL_T = _pool_matrix()


def simple_model_forward(x_nchw, params):
    """x_nchw: (N, 3, 16, 16) float32. Returns (N, 10) logits."""
    wc, bc, w1, b1, w2, b2 = (params["wc"], params["bc"], params["w1"],
                              params["b1"], params["w2"], params["b2"])
    N, Cin, Hx, Wx = x_nchw.shape
    assert (Cin, Hx, Wx) == (CIN, H, W)

    # --- trace-time glue: NCHW -> NHWC, pad, im2col in transposed layout ---
    # patches_T[n, kh*9 + kw*3 + cin, h*16 + w] = x_pad[n, h+kh, w+kw, cin]
    x = jnp.transpose(x_nchw, (0, 2, 3, 1))                     # (N,16,16,3)
    xp = jnp.pad(x, ((0, 0), (1, 1), (1, 1), (0, 0)))           # (N,18,18,3)
    taps = [xp[:, kh:kh + H, kw:kw + W, :]
            for kh in range(3) for kw in range(3)]
    pt = jnp.stack(taps, axis=1)                                # (N,9,16,16,3)
    pt = jnp.transpose(pt, (0, 1, 4, 2, 3))                     # (N,9,3,16,16)
    patches_T = pt.reshape(N, KTAPS, H * W)                     # (N,27,256)

    # Weight prep (cheap, weights only).  NOTE: conv weight convention here is
    # (kh, kw, cin, cout) and linear weights are (in, out); loading real
    # PyTorch tensors ((cout,cin,kh,kw) / (out,in)) requires a transpose first.
    wct = wc.reshape(KTAPS, COUT).T                             # (32, 27)
    bc_col = bc.reshape(COUT, 1)                                # (32, 1)
    w1r = w1.reshape(COUT, CELLS, HID)                          # (32, 16, 64)
    b1_row = b1.reshape(1, HID)
    b2_row = b2.reshape(1, NCLS)

    out = pl.pallas_call(
        fused_forward_kernel,
        out_shape=jax.ShapeDtypeStruct((N, 1, NCLS), jnp.float32),
        grid=(N,),
        in_specs=[
            pl.BlockSpec((1, KTAPS, H * W), lambda n: (n, 0, 0)),
            pl.BlockSpec((COUT, KTAPS), lambda n: (0, 0)),
            pl.BlockSpec((COUT, 1), lambda n: (0, 0)),
            pl.BlockSpec((H * W, CELLS), lambda n: (0, 0)),
            pl.BlockSpec((COUT, CELLS, HID), lambda n: (0, 0, 0)),
            pl.BlockSpec((1, HID), lambda n: (0, 0)),
            pl.BlockSpec((HID, NCLS), lambda n: (0, 0)),
            pl.BlockSpec((1, NCLS), lambda n: (0, 0)),
        ],
        out_specs=pl.BlockSpec((1, 1, NCLS), lambda n: (n, 0, 0)),
        compiler_params=pltpu.CompilerParams(
            dimension_semantics=("parallel",)),
    )(patches_T, wct, bc_col, _POOL_T, w1r, b1_row, w2, b2_row)

    return out.reshape(N, NCLS)


# ---------------------------------------------------------------------------
# Pure-JAX reference (independent path) + params
# ---------------------------------------------------------------------------
def reference_forward(x_nchw, params):
    wc, bc, w1, b1, w2, b2 = (params["wc"], params["bc"], params["w1"],
                              params["b1"], params["w2"], params["b2"])
    conv = jax.lax.conv_general_dilated(
        x_nchw, wc, window_strides=(1, 1), padding="SAME",
        dimension_numbers=("NCHW", "HWIO", "NCHW"))             # (N,32,16,16)
    conv = jax.nn.relu(conv + bc[None, :, None, None])
    N = x_nchw.shape[0]
    pooled = conv.reshape(N, COUT, POOL, H // POOL, POOL, W // POOL)
    pooled = pooled.mean(axis=(3, 5))                           # (N,32,4,4)
    feat = pooled.reshape(N, COUT * CELLS)                      # PyTorch flatten
    h = jax.nn.relu(feat @ w1 + b1)
    return h @ w2 + b2


def init_params(key):
    k = jax.random.split(key, 6)
    wc = jax.random.normal(k[0], (3, 3, CIN, COUT), jnp.float32) * 0.1
    bc = jax.random.normal(k[1], (COUT,), jnp.float32) * 0.1
    w1 = jax.random.normal(k[2], (COUT * CELLS, HID), jnp.float32) * 0.05
    b1 = jax.random.normal(k[3], (HID,), jnp.float32) * 0.05
    w2 = jax.random.normal(k[4], (HID, NCLS), jnp.float32) * 0.05
    b2 = jax.random.normal(k[5], (NCLS,), jnp.float32) * 0.05
    return {"wc": wc, "bc": bc, "w1": w1, "b1": b1, "w2": w2, "b2": b2}


if __name__ == "__main__":
    key = jax.random.PRNGKey(0)
    kx, kp = jax.random.split(key)
    # Input in PyTorch NCHW convention: (batch=2, channels=3, 16, 16)
    x = jax.random.normal(kx, (2, CIN, H, W), jnp.float32)
    params = init_params(kp)

    fwd = jax.jit(simple_model_forward)
    out = jax.block_until_ready(fwd(x, params))
    assert out.shape == (2, NCLS) and out.dtype == jnp.float32

    ref = jax.block_until_ready(reference_forward(x, params))
    np.testing.assert_allclose(np.asarray(out), np.asarray(ref),
                               rtol=1e-2, atol=1e-2)

    print("KERNEL_OK")
</pallas_src>

<mosaic_0001>
module attributes {stable_mosaic.version = 11 : i64} {
  func.func @fused_forward_kernel(%arg0: i32, %arg1: memref<1x27x256xf32, #tpu.memory_space<vmem>>, %arg2: memref<32x27xf32, #tpu.memory_space<vmem>>, %arg3: memref<32x1xf32, #tpu.memory_space<vmem>>, %arg4: memref<256x16xf32, #tpu.memory_space<vmem>>, %arg5: memref<32x16x64xf32, #tpu.memory_space<vmem>>, %arg6: memref<1x64xf32, #tpu.memory_space<vmem>>, %arg7: memref<64x10xf32, #tpu.memory_space<vmem>>, %arg8: memref<1x10xf32, #tpu.memory_space<vmem>>, %arg9: memref<1x1x10xf32, #tpu.memory_space<vmem>>) attributes {dimension_semantics = [#tpu.dimension_semantics<parallel>], iteration_bounds = array<i64: 2>, scalar_prefetch = 0 : i64, scratch_operands = 0 : i64, tpu.core_type = #tpu.core_type<tc>, window_params = [{transform_indices = @transform_0, window_bounds = array<i64: 1, 27, 256>}, {pipeline_mode = #tpu.pipeline_mode<synchronous>, transform_indices = @transform_1, window_bounds = array<i64: 32, 27>}, {pipeline_mode = #tpu.pipeline_mode<synchronous>, transform_indices = @transform_2, window_bounds = array<i64: 32, 1>}, {pipeline_mode = #tpu.pipeline_mode<synchronous>, transform_indices = @transform_3, window_bounds = array<i64: 256, 16>}, {pipeline_mode = #tpu.pipeline_mode<synchronous>, transform_indices = @transform_4, window_bounds = array<i64: 32, 16, 64>}, {pipeline_mode = #tpu.pipeline_mode<synchronous>, transform_indices = @transform_5, window_bounds = array<i64: 1, 64>}, {pipeline_mode = #tpu.pipeline_mode<synchronous>, transform_indices = @transform_6, window_bounds = array<i64: 64, 10>}, {pipeline_mode = #tpu.pipeline_mode<synchronous>, transform_indices = @transform_7, window_bounds = array<i64: 1, 10>}, {transform_indices = @transform_8, window_bounds = array<i64: 1, 1, 10>}]} {
    %c0 = arith.constant 0 : index
    %c0_0 = arith.constant 0 : index
    %c0_1 = arith.constant 0 : index
    %0 = vector.load %arg1[%c0, %c0_0, %c0_1] : memref<1x27x256xf32, #tpu.memory_space<vmem>>, vector<1x27x256xf32>
    %1 = vector.shape_cast %0 : vector<1x27x256xf32> to vector<27x256xf32>
    %c0_2 = arith.constant 0 : index
    %c0_3 = arith.constant 0 : index
    %2 = vector.load %arg2[%c0_2, %c0_3] : memref<32x27xf32, #tpu.memory_space<vmem>>, vector<32x27xf32>
    %cst = arith.constant dense<0.000000e+00> : vector<32x256xf32>
    %3 = tpu.matmul %2, %1, %cst {dimension_numbers = #tpu.dot_dimension_numbers<[1], [0], [0], [1], [0, 0, 1, 1], [], []>} : vector<32x27xf32>, vector<27x256xf32>, vector<32x256xf32> -> vector<32x256xf32>
    %c0_4 = arith.constant 0 : index
    %c0_5 = arith.constant 0 : index
    %4 = vector.load %arg3[%c0_4, %c0_5] : memref<32x1xf32, #tpu.memory_space<vmem>>, vector<32x1xf32>
    %5 = vector.broadcast %4 : vector<32x1xf32> to vector<32x256xf32>
    %6 = arith.addf %3, %5 : vector<32x256xf32>
    %cst_6 = arith.constant 0.000000e+00 : f32
    %7 = vector.broadcast %cst_6 : f32 to vector<32x256xf32>
    %8 = arith.maximumf %6, %7 : vector<32x256xf32>
    %c0_7 = arith.constant 0 : index
    %c0_8 = arith.constant 0 : index
    %9 = vector.load %arg4[%c0_7, %c0_8] : memref<256x16xf32, #tpu.memory_space<vmem>>, vector<256x16xf32>
    %cst_9 = arith.constant dense<0.000000e+00> : vector<32x16xf32>
    %10 = tpu.matmul %8, %9, %cst_9 {dimension_numbers = #tpu.dot_dimension_numbers<[1], [0], [0], [1], [0, 0, 1, 1], [], []>} : vector<32x256xf32>, vector<256x16xf32>, vector<32x16xf32> -> vector<32x16xf32>
    %c0_10 = arith.constant 0 : index
    %c0_11 = arith.constant 0 : index
    %11 = vector.load %arg6[%c0_10, %c0_11] : memref<1x64xf32, #tpu.memory_space<vmem>>, vector<1x64xf32>
    %12 = vector.extract_strided_slice %10 {offsets = [0, 0], sizes = [1, 16], strides = [1, 1]} : vector<32x16xf32> to vector<1x16xf32>
    %c0_12 = arith.constant 0 : index
    %c0_13 = arith.constant 0 : index
    %c0_14 = arith.constant 0 : index
    %13 = vector.load %arg5[%c0_12, %c0_13, %c0_14] : memref<32x16x64xf32, #tpu.memory_space<vmem>>, vector<1x16x64xf32>
    %14 = vector.shape_cast %13 : vector<1x16x64xf32> to vector<16x64xf32>
    %cst_15 = arith.constant dense<0.000000e+00> : vector<1x64xf32>
    %15 = tpu.matmul %12, %14, %cst_15 {dimension_numbers = #tpu.dot_dimension_numbers<[1], [0], [0], [1], [0, 0, 1, 1], [], []>} : vector<1x16xf32>, vector<16x64xf32>, vector<1x64xf32> -> vector<1x64xf32>
    %16 = arith.addf %11, %15 : vector<1x64xf32>
    %17 = vector.extract_strided_slice %10 {offsets = [1, 0], sizes = [1, 16], strides = [1, 1]} : vector<32x16xf32> to vector<1x16xf32>
    %c1 = arith.constant 1 : index
    %c0_16 = arith.constant 0 : index
    %c0_17 = arith.constant 0 : index
    %18 = vector.load %arg5[%c1, %c0_16, %c0_17] : memref<32x16x64xf32, #tpu.memory_space<vmem>>, vector<1x16x64xf32>
    %19 = vector.shape_cast %18 : vector<1x16x64xf32> to vector<16x64xf32>
    %cst_18 = arith.constant dense<0.000000e+00> : vector<1x64xf32>
    %20 = tpu.matmul %17, %19, %cst_18 {dimension_numbers = #tpu.dot_dimension_numbers<[1], [0], [0], [1], [0, 0, 1, 1], [], []>} : vector<1x16xf32>, vector<16x64xf32>, vector<1x64xf32> -> vector<1x64xf32>
    %21 = arith.addf %16, %20 : vector<1x64xf32>
    %22 = vector.extract_strided_slice %10 {offsets = [2, 0], sizes = [1, 16], strides = [1, 1]} : vector<32x16xf32> to vector<1x16xf32>
    %c2 = arith.constant 2 : index
    %c0_19 = arith.constant 0 : index
    %c0_20 = arith.constant 0 : index
    %23 = vector.load %arg5[%c2, %c0_19, %c0_20] : memref<32x16x64xf32, #tpu.memory_space<vmem>>, vector<1x16x64xf32>
    %24 = vector.shape_cast %23 : vector<1x16x64xf32> to vector<16x64xf32>
    %cst_21 = arith.constant dense<0.000000e+00> : vector<1x64xf32>
    %25 = tpu.matmul %22, %24, %cst_21 {dimension_numbers = #tpu.dot_dimension_numbers<[1], [0], [0], [1], [0, 0, 1, 1], [], []>} : vector<1x16xf32>, vector<16x64xf32>, vector<1x64xf32> -> vector<1x64xf32>
    %26 = arith.addf %21, %25 : vector<1x64xf32>
    %27 = vector.extract_strided_slice %10 {offsets = [3, 0], sizes = [1, 16], strides = [1, 1]} : vector<32x16xf32> to vector<1x16xf32>
    %c3 = arith.constant 3 : index
    %c0_22 = arith.constant 0 : index
    %c0_23 = arith.constant 0 : index
    %28 = vector.load %arg5[%c3, %c0_22, %c0_23] : memref<32x16x64xf32, #tpu.memory_space<vmem>>, vector<1x16x64xf32>
    %29 = vector.shape_cast %28 : vector<1x16x64xf32> to vector<16x64xf32>
    %cst_24 = arith.constant dense<0.000000e+00> : vector<1x64xf32>
    %30 = tpu.matmul %27, %29, %cst_24 {dimension_numbers = #tpu.dot_dimension_numbers<[1], [0], [0], [1], [0, 0, 1, 1], [], []>} : vector<1x16xf32>, vector<16x64xf32>, vector<1x64xf32> -> vector<1x64xf32>
    %31 = arith.addf %26, %30 : vector<1x64xf32>
    %32 = vector.extract_strided_slice %10 {offsets = [4, 0], sizes = [1, 16], strides = [1, 1]} : vector<32x16xf32> to vector<1x16xf32>
    %c4 = arith.constant 4 : index
    %c0_25 = arith.constant 0 : index
    %c0_26 = arith.constant 0 : index
    %33 = vector.load %arg5[%c4, %c0_25, %c0_26] : memref<32x16x64xf32, #tpu.memory_space<vmem>>, vector<1x16x64xf32>
    %34 = vector.shape_cast %33 : vector<1x16x64xf32> to vector<16x64xf32>
    %cst_27 = arith.constant dense<0.000000e+00> : vector<1x64xf32>
    %35 = tpu.matmul %32, %34, %cst_27 {dimension_numbers = #tpu.dot_dimension_numbers<[1], [0], [0], [1], [0, 0, 1, 1], [], []>} : vector<1x16xf32>, vector<16x64xf32>, vector<1x64xf32> -> vector<1x64xf32>
    %36 = arith.addf %31, %35 : vector<1x64xf32>
    %37 = vector.extract_strided_slice %10 {offsets = [5, 0], sizes = [1, 16], strides = [1, 1]} : vector<32x16xf32> to vector<1x16xf32>
    %c5 = arith.constant 5 : index
    %c0_28 = arith.constant 0 : index
    %c0_29 = arith.constant 0 : index
    %38 = vector.load %arg5[%c5, %c0_28, %c0_29] : memref<32x16x64xf32, #tpu.memory_space<vmem>>, vector<1x16x64xf32>
    %39 = vector.shape_cast %38 : vector<1x16x64xf32> to vector<16x64xf32>
    %cst_30 = arith.constant dense<0.000000e+00> : vector<1x64xf32>
    %40 = tpu.matmul %37, %39, %cst_30 {dimension_numbers = #tpu.dot_dimension_numbers<[1], [0], [0], [1], [0, 0, 1, 1], [], []>} : vector<1x16xf32>, vector<16x64xf32>, vector<1x64xf32> -> vector<1x64xf32>
    %41 = arith.addf %36, %40 : vector<1x64xf32>
    %42 = vector.extract_strided_slice %10 {offsets = [6, 0], sizes = [1, 16], strides = [1, 1]} : vector<32x16xf32> to vector<1x16xf32>
    %c6 = arith.constant 6 : index
    %c0_31 = arith.constant 0 : index
    %c0_32 = arith.constant 0 : index
    %43 = vector.load %arg5[%c6, %c0_31, %c0_32] : memref<32x16x64xf32, #tpu.memory_space<vmem>>, vector<1x16x64xf32>
    %44 = vector.shape_cast %43 : vector<1x16x64xf32> to vector<16x64xf32>
    %cst_33 = arith.constant dense<0.000000e+00> : vector<1x64xf32>
    %45 = tpu.matmul %42, %44, %cst_33 {dimension_numbers = #tpu.dot_dimension_numbers<[1], [0], [0], [1], [0, 0, 1, 1], [], []>} : vector<1x16xf32>, vector<16x64xf32>, vector<1x64xf32> -> vector<1x64xf32>
    %46 = arith.addf %41, %45 : vector<1x64xf32>
    %47 = vector.extract_strided_slice %10 {offsets = [7, 0], sizes = [1, 16], strides = [1, 1]} : vector<32x16xf32> to vector<1x16xf32>
    %c7 = arith.constant 7 : index
    %c0_34 = arith.constant 0 : index
    %c0_35 = arith.constant 0 : index
    %48 = vector.load %arg5[%c7, %c0_34, %c0_35] : memref<32x16x64xf32, #tpu.memory_space<vmem>>, vector<1x16x64xf32>
    %49 = vector.shape_cast %48 : vector<1x16x64xf32> to vector<16x64xf32>
    %cst_36 = arith.constant dense<0.000000e+00> : vector<1x64xf32>
    %50 = tpu.matmul %47, %49, %cst_36 {dimension_numbers = #tpu.dot_dimension_numbers<[1], [0], [0], [1], [0, 0, 1, 1], [], []>} : vector<1x16xf32>, vector<16x64xf32>, vector<1x64xf32> -> vector<1x64xf32>
    %51 = arith.addf %46, %50 : vector<1x64xf32>
    %52 = vector.extract_strided_slice %10 {offsets = [8, 0], sizes = [1, 16], strides = [1, 1]} : vector<32x16xf32> to vector<1x16xf32>
    %c8 = arith.constant 8 : index
    %c0_37 = arith.constant 0 : index
    %c0_38 = arith.constant 0 : index
    %53 = vector.load %arg5[%c8, %c0_37, %c0_38] : memref<32x16x64xf32, #tpu.memory_space<vmem>>, vector<1x16x64xf32>
    %54 = vector.shape_cast %53 : vector<1x16x64xf32> to vector<16x64xf32>
    %cst_39 = arith.constant dense<0.000000e+00> : vector<1x64xf32>
    %55 = tpu.matmul %52, %54, %cst_39 {dimension_numbers = #tpu.dot_dimension_numbers<[1], [0], [0], [1], [0, 0, 1, 1], [], []>} : vector<1x16xf32>, vector<16x64xf32>, vector<1x64xf32> -> vector<1x64xf32>
    %56 = arith.addf %51, %55 : vector<1x64xf32>
    %57 = vector.extract_strided_slice %10 {offsets = [9, 0], sizes = [1, 16], strides = [1, 1]} : vector<32x16xf32> to vector<1x16xf32>
    %c9 = arith.constant 9 : index
    %c0_40 = arith.constant 0 : index
    %c0_41 = arith.constant 0 : index
    %58 = vector.load %arg5[%c9, %c0_40, %c0_41] : memref<32x16x64xf32, #tpu.memory_space<vmem>>, vector<1x16x64xf32>
    %59 = vector.shape_cast %58 : vector<1x16x64xf32> to vector<16x64xf32>
    %cst_42 = arith.constant dense<0.000000e+00> : vector<1x64xf32>
    %60 = tpu.matmul %57, %59, %cst_42 {dimension_numbers = #tpu.dot_dimension_numbers<[1], [0], [0], [1], [0, 0, 1, 1], [], []>} : vector<1x16xf32>, vector<16x64xf32>, vector<1x64xf32> -> vector<1x64xf32>
    %61 = arith.addf %56, %60 : vector<1x64xf32>
    %62 = vector.extract_strided_slice %10 {offsets = [10, 0], sizes = [1, 16], strides = [1, 1]} : vector<32x16xf32> to vector<1x16xf32>
    %c10 = arith.constant 10 : index
    %c0_43 = arith.constant 0 : index
    %c0_44 = arith.constant 0 : index
    %63 = vector.load %arg5[%c10, %c0_43, %c0_44] : memref<32x16x64xf32, #tpu.memory_space<vmem>>, vector<1x16x64xf32>
    %64 = vector.shape_cast %63 : vector<1x16x64xf32> to vector<16x64xf32>
    %cst_45 = arith.constant dense<0.000000e+00> : vector<1x64xf32>
    %65 = tpu.matmul %62, %64, %cst_45 {dimension_numbers = #tpu.dot_dimension_numbers<[1], [0], [0], [1], [0, 0, 1, 1], [], []>} : vector<1x16xf32>, vector<16x64xf32>, vector<1x64xf32> -> vector<1x64xf32>
    %66 = arith.addf %61, %65 : vector<1x64xf32>
    %67 = vector.extract_strided_slice %10 {offsets = [11, 0], sizes = [1, 16], strides = [1, 1]} : vector<32x16xf32> to vector<1x16xf32>
    %c11 = arith.constant 11 : index
    %c0_46 = arith.constant 0 : index
    %c0_47 = arith.constant 0 : index
    %68 = vector.load %arg5[%c11, %c0_46, %c0_47] : memref<32x16x64xf32, #tpu.memory_space<vmem>>, vector<1x16x64xf32>
    %69 = vector.shape_cast %68 : vector<1x16x64xf32> to vector<16x64xf32>
    %cst_48 = arith.constant dense<0.000000e+00> : vector<1x64xf32>
    %70 = tpu.matmul %67, %69, %cst_48 {dimension_numbers = #tpu.dot_dimension_numbers<[1], [0], [0], [1], [0, 0, 1, 1], [], []>} : vector<1x16xf32>, vector<16x64xf32>, vector<1x64xf32> -> vector<1x64xf32>
    %71 = arith.addf %66, %70 : vector<1x64xf32>
    %72 = vector.extract_strided_slice %10 {offsets = [12, 0], sizes = [1, 16], strides = [1, 1]} : vector<32x16xf32> to vector<1x16xf32>
    %c12 = arith.constant 12 : index
    %c0_49 = arith.constant 0 : index
    %c0_50 = arith.constant 0 : index
    %73 = vector.load %arg5[%c12, %c0_49, %c0_50] : memref<32x16x64xf32, #tpu.memory_space<vmem>>, vector<1x16x64xf32>
    %74 = vector.shape_cast %73 : vector<1x16x64xf32> to vector<16x64xf32>
    %cst_51 = arith.constant dense<0.000000e+00> : vector<1x64xf32>
    %75 = tpu.matmul %72, %74, %cst_51 {dimension_numbers = #tpu.dot_dimension_numbers<[1], [0], [0], [1], [0, 0, 1, 1], [], []>} : vector<1x16xf32>, vector<16x64xf32>, vector<1x64xf32> -> vector<1x64xf32>
    %76 = arith.addf %71, %75 : vector<1x64xf32>
    %77 = vector.extract_strided_slice %10 {offsets = [13, 0], sizes = [1, 16], strides = [1, 1]} : vector<32x16xf32> to vector<1x16xf32>
    %c13 = arith.constant 13 : index
    %c0_52 = arith.constant 0 : index
    %c0_53 = arith.constant 0 : index
    %78 = vector.load %arg5[%c13, %c0_52, %c0_53] : memref<32x16x64xf32, #tpu.memory_space<vmem>>, vector<1x16x64xf32>
    %79 = vector.shape_cast %78 : vector<1x16x64xf32> to vector<16x64xf32>
    %cst_54 = arith.constant dense<0.000000e+00> : vector<1x64xf32>
    %80 = tpu.matmul %77, %79, %cst_54 {dimension_numbers = #tpu.dot_dimension_numbers<[1], [0], [0], [1], [0, 0, 1, 1], [], []>} : vector<1x16xf32>, vector<16x64xf32>, vector<1x64xf32> -> vector<1x64xf32>
    %81 = arith.addf %76, %80 : vector<1x64xf32>
    %82 = vector.extract_strided_slice %10 {offsets = [14, 0], sizes = [1, 16], strides = [1, 1]} : vector<32x16xf32> to vector<1x16xf32>
    %c14 = arith.constant 14 : index
    %c0_55 = arith.constant 0 : index
    %c0_56 = arith.constant 0 : index
    %83 = vector.load %arg5[%c14, %c0_55, %c0_56] : memref<32x16x64xf32, #tpu.memory_space<vmem>>, vector<1x16x64xf32>
    %84 = vector.shape_cast %83 : vector<1x16x64xf32> to vector<16x64xf32>
    %cst_57 = arith.constant dense<0.000000e+00> : vector<1x64xf32>
    %85 = tpu.matmul %82, %84, %cst_57 {dimension_numbers = #tpu.dot_dimension_numbers<[1], [0], [0], [1], [0, 0, 1, 1], [], []>} : vector<1x16xf32>, vector<16x64xf32>, vector<1x64xf32> -> vector<1x64xf32>
    %86 = arith.addf %81, %85 : vector<1x64xf32>
    %87 = vector.extract_strided_slice %10 {offsets = [15, 0], sizes = [1, 16], strides = [1, 1]} : vector<32x16xf32> to vector<1x16xf32>
    %c15 = arith.constant 15 : index
    %c0_58 = arith.constant 0 : index
    %c0_59 = arith.constant 0 : index
    %88 = vector.load %arg5[%c15, %c0_58, %c0_59] : memref<32x16x64xf32, #tpu.memory_space<vmem>>, vector<1x16x64xf32>
    %89 = vector.shape_cast %88 : vector<1x16x64xf32> to vector<16x64xf32>
    %cst_60 = arith.constant dense<0.000000e+00> : vector<1x64xf32>
    %90 = tpu.matmul %87, %89, %cst_60 {dimension_numbers = #tpu.dot_dimension_numbers<[1], [0], [0], [1], [0, 0, 1, 1], [], []>} : vector<1x16xf32>, vector<16x64xf32>, vector<1x64xf32> -> vector<1x64xf32>
    %91 = arith.addf %86, %90 : vector<1x64xf32>
    %92 = vector.extract_strided_slice %10 {offsets = [16, 0], sizes = [1, 16], strides = [1, 1]} : vector<32x16xf32> to vector<1x16xf32>
    %c16 = arith.constant 16 : index
    %c0_61 = arith.constant 0 : index
    %c0_62 = arith.constant 0 : index
    %93 = vector.load %arg5[%c16, %c0_61, %c0_62] : memref<32x16x64xf32, #tpu.memory_space<vmem>>, vector<1x16x64xf32>
    %94 = vector.shape_cast %93 : vector<1x16x64xf32> to vector<16x64xf32>
    %cst_63 = arith.constant dense<0.000000e+00> : vector<1x64xf32>
    %95 = tpu.matmul %92, %94, %cst_63 {dimension_numbers = #tpu.dot_dimension_numbers<[1], [0], [0], [1], [0, 0, 1, 1], [], []>} : vector<1x16xf32>, vector<16x64xf32>, vector<1x64xf32> -> vector<1x64xf32>
    %96 = arith.addf %91, %95 : vector<1x64xf32>
    %97 = vector.extract_strided_slice %10 {offsets = [17, 0], sizes = [1, 16], strides = [1, 1]} : vector<32x16xf32> to vector<1x16xf32>
    %c17 = arith.constant 17 : index
    %c0_64 = arith.constant 0 : index
    %c0_65 = arith.constant 0 : index
    %98 = vector.load %arg5[%c17, %c0_64, %c0_65] : memref<32x16x64xf32, #tpu.memory_space<vmem>>, vector<1x16x64xf32>
    %99 = vector.shape_cast %98 : vector<1x16x64xf32> to vector<16x64xf32>
    %cst_66 = arith.constant dense<0.000000e+00> : vector<1x64xf32>
    %100 = tpu.matmul %97, %99, %cst_66 {dimension_numbers = #tpu.dot_dimension_numbers<[1], [0], [0], [1], [0, 0, 1, 1], [], []>} : vector<1x16xf32>, vector<16x64xf32>, vector<1x64xf32> -> vector<1x64xf32>
    %101 = arith.addf %96, %100 : vector<1x64xf32>
    %102 = vector.extract_strided_slice %10 {offsets = [18, 0], sizes = [1, 16], strides = [1, 1]} : vector<32x16xf32> to vector<1x16xf32>
    %c18 = arith.constant 18 : index
    %c0_67 = arith.constant 0 : index
    %c0_68 = arith.constant 0 : index
    %103 = vector.load %arg5[%c18, %c0_67, %c0_68] : memref<32x16x64xf32, #tpu.memory_space<vmem>>, vector<1x16x64xf32>
    %104 = vector.shape_cast %103 : vector<1x16x64xf32> to vector<16x64xf32>
    %cst_69 = arith.constant dense<0.000000e+00> : vector<1x64xf32>
    %105 = tpu.matmul %102, %104, %cst_69 {dimension_numbers = #tpu.dot_dimension_numbers<[1], [0], [0], [1], [0, 0, 1, 1], [], []>} : vector<1x16xf32>, vector<16x64xf32>, vector<1x64xf32> -> vector<1x64xf32>
    %106 = arith.addf %101, %105 : vector<1x64xf32>
    %107 = vector.extract_strided_slice %10 {offsets = [19, 0], sizes = [1, 16], strides = [1, 1]} : vector<32x16xf32> to vector<1x16xf32>
    %c19 = arith.constant 19 : index
    %c0_70 = arith.constant 0 : index
    %c0_71 = arith.constant 0 : index
    %108 = vector.load %arg5[%c19, %c0_70, %c0_71] : memref<32x16x64xf32, #tpu.memory_space<vmem>>, vector<1x16x64xf32>
    %109 = vector.shape_cast %108 : vector<1x16x64xf32> to vector<16x64xf32>
    %cst_72 = arith.constant dense<0.000000e+00> : vector<1x64xf32>
    %110 = tpu.matmul %107, %109, %cst_72 {dimension_numbers = #tpu.dot_dimension_numbers<[1], [0], [0], [1], [0, 0, 1, 1], [], []>} : vector<1x16xf32>, vector<16x64xf32>, vector<1x64xf32> -> vector<1x64xf32>
    %111 = arith.addf %106, %110 : vector<1x64xf32>
    %112 = vector.extract_strided_slice %10 {offsets = [20, 0], sizes = [1, 16], strides = [1, 1]} : vector<32x16xf32> to vector<1x16xf32>
    %c20 = arith.constant 20 : index
    %c0_73 = arith.constant 0 : index
    %c0_74 = arith.constant 0 : index
    %113 = vector.load %arg5[%c20, %c0_73, %c0_74] : memref<32x16x64xf32, #tpu.memory_space<vmem>>, vector<1x16x64xf32>
    %114 = vector.shape_cast %113 : vector<1x16x64xf32> to vector<16x64xf32>
    %cst_75 = arith.constant dense<0.000000e+00> : vector<1x64xf32>
    %115 = tpu.matmul %112, %114, %cst_75 {dimension_numbers = #tpu.dot_dimension_numbers<[1], [0], [0], [1], [0, 0, 1, 1], [], []>} : vector<1x16xf32>, vector<16x64xf32>, vector<1x64xf32> -> vector<1x64xf32>
    %116 = arith.addf %111, %115 : vector<1x64xf32>
    %117 = vector.extract_strided_slice %10 {offsets = [21, 0], sizes = [1, 16], strides = [1, 1]} : vector<32x16xf32> to vector<1x16xf32>
    %c21 = arith.constant 21 : index
    %c0_76 = arith.constant 0 : index
    %c0_77 = arith.constant 0 : index
    %118 = vector.load %arg5[%c21, %c0_76, %c0_77] : memref<32x16x64xf32, #tpu.memory_space<vmem>>, vector<1x16x64xf32>
    %119 = vector.shape_cast %118 : vector<1x16x64xf32> to vector<16x64xf32>
    %cst_78 = arith.constant dense<0.000000e+00> : vector<1x64xf32>
    %120 = tpu.matmul %117, %119, %cst_78 {dimension_numbers = #tpu.dot_dimension_numbers<[1], [0], [0], [1], [0, 0, 1, 1], [], []>} : vector<1x16xf32>, vector<16x64xf32>, vector<1x64xf32> -> vector<1x64xf32>
    %121 = arith.addf %116, %120 : vector<1x64xf32>
    %122 = vector.extract_strided_slice %10 {offsets = [22, 0], sizes = [1, 16], strides = [1, 1]} : vector<32x16xf32> to vector<1x16xf32>
    %c22 = arith.constant 22 : index
    %c0_79 = arith.constant 0 : index
    %c0_80 = arith.constant 0 : index
    %123 = vector.load %arg5[%c22, %c0_79, %c0_80] : memref<32x16x64xf32, #tpu.memory_space<vmem>>, vector<1x16x64xf32>
    %124 = vector.shape_cast %123 : vector<1x16x64xf32> to vector<16x64xf32>
    %cst_81 = arith.constant dense<0.000000e+00> : vector<1x64xf32>
    %125 = tpu.matmul %122, %124, %cst_81 {dimension_numbers = #tpu.dot_dimension_numbers<[1], [0], [0], [1], [0, 0, 1, 1], [], []>} : vector<1x16xf32>, vector<16x64xf32>, vector<1x64xf32> -> vector<1x64xf32>
    %126 = arith.addf %121, %125 : vector<1x64xf32>
    %127 = vector.extract_strided_slice %10 {offsets = [23, 0], sizes = [1, 16], strides = [1, 1]} : vector<32x16xf32> to vector<1x16xf32>
    %c23 = arith.constant 23 : index
    %c0_82 = arith.constant 0 : index
    %c0_83 = arith.constant 0 : index
    %128 = vector.load %arg5[%c23, %c0_82, %c0_83] : memref<32x16x64xf32, #tpu.memory_space<vmem>>, vector<1x16x64xf32>
    %129 = vector.shape_cast %128 : vector<1x16x64xf32> to vector<16x64xf32>
    %cst_84 = arith.constant dense<0.000000e+00> : vector<1x64xf32>
    %130 = tpu.matmul %127, %129, %cst_84 {dimension_numbers = #tpu.dot_dimension_numbers<[1], [0], [0], [1], [0, 0, 1, 1], [], []>} : vector<1x16xf32>, vector<16x64xf32>, vector<1x64xf32> -> vector<1x64xf32>
    %131 = arith.addf %126, %130 : vector<1x64xf32>
    %132 = vector.extract_strided_slice %10 {offsets = [24, 0], sizes = [1, 16], strides = [1, 1]} : vector<32x16xf32> to vector<1x16xf32>
    %c24 = arith.constant 24 : index
    %c0_85 = arith.constant 0 : index
    %c0_86 = arith.constant 0 : index
    %133 = vector.load %arg5[%c24, %c0_85, %c0_86] : memref<32x16x64xf32, #tpu.memory_space<vmem>>, vector<1x16x64xf32>
    %134 = vector.shape_cast %133 : vector<1x16x64xf32> to vector<16x64xf32>
    %cst_87 = arith.constant dense<0.000000e+00> : vector<1x64xf32>
    %135 = tpu.matmul %132, %134, %cst_87 {dimension_numbers = #tpu.dot_dimension_numbers<[1], [0], [0], [1], [0, 0, 1, 1], [], []>} : vector<1x16xf32>, vector<16x64xf32>, vector<1x64xf32> -> vector<1x64xf32>
    %136 = arith.addf %131, %135 : vector<1x64xf32>
    %137 = vector.extract_strided_slice %10 {offsets = [25, 0], sizes = [1, 16], strides = [1, 1]} : vector<32x16xf32> to vector<1x16xf32>
    %c25 = arith.constant 25 : index
    %c0_88 = arith.constant 0 : index
    %c0_89 = arith.constant 0 : index
    %138 = vector.load %arg5[%c25, %c0_88, %c0_89] : memref<32x16x64xf32, #tpu.memory_space<vmem>>, vector<1x16x64xf32>
    %139 = vector.shape_cast %138 : vector<1x16x64xf32> to vector<16x64xf32>
    %cst_90 = arith.constant dense<0.000000e+00> : vector<1x64xf32>
    %140 = tpu.matmul %137, %139, %cst_90 {dimension_numbers = #tpu.dot_dimension_numbers<[1], [0], [0], [1], [0, 0, 1, 1], [], []>} : vector<1x16xf32>, vector<16x64xf32>, vector<1x64xf32> -> vector<1x64xf32>
    %141 = arith.addf %136, %140 : vector<1x64xf32>
    %142 = vector.extract_strided_slice %10 {offsets = [26, 0], sizes = [1, 16], strides = [1, 1]} : vector<32x16xf32> to vector<1x16xf32>
    %c26 = arith.constant 26 : index
    %c0_91 = arith.constant 0 : index
    %c0_92 = arith.constant 0 : index
    %143 = vector.load %arg5[%c26, %c0_91, %c0_92] : memref<32x16x64xf32, #tpu.memory_space<vmem>>, vector<1x16x64xf32>
    %144 = vector.shape_cast %143 : vector<1x16x64xf32> to vector<16x64xf32>
    %cst_93 = arith.constant dense<0.000000e+00> : vector<1x64xf32>
    %145 = tpu.matmul %142, %144, %cst_93 {dimension_numbers = #tpu.dot_dimension_numbers<[1], [0], [0], [1], [0, 0, 1, 1], [], []>} : vector<1x16xf32>, vector<16x64xf32>, vector<1x64xf32> -> vector<1x64xf32>
    %146 = arith.addf %141, %145 : vector<1x64xf32>
    %147 = vector.extract_strided_slice %10 {offsets = [27, 0], sizes = [1, 16], strides = [1, 1]} : vector<32x16xf32> to vector<1x16xf32>
    %c27 = arith.constant 27 : index
    %c0_94 = arith.constant 0 : index
    %c0_95 = arith.constant 0 : index
    %148 = vector.load %arg5[%c27, %c0_94, %c0_95] : memref<32x16x64xf32, #tpu.memory_space<vmem>>, vector<1x16x64xf32>
    %149 = vector.shape_cast %148 : vector<1x16x64xf32> to vector<16x64xf32>
    %cst_96 = arith.constant dense<0.000000e+00> : vector<1x64xf32>
    %150 = tpu.matmul %147, %149, %cst_96 {dimension_numbers = #tpu.dot_dimension_numbers<[1], [0], [0], [1], [0, 0, 1, 1], [], []>} : vector<1x16xf32>, vector<16x64xf32>, vector<1x64xf32> -> vector<1x64xf32>
    %151 = arith.addf %146, %150 : vector<1x64xf32>
    %152 = vector.extract_strided_slice %10 {offsets = [28, 0], sizes = [1, 16], strides = [1, 1]} : vector<32x16xf32> to vector<1x16xf32>
    %c28 = arith.constant 28 : index
    %c0_97 = arith.constant 0 : index
    %c0_98 = arith.constant 0 : index
    %153 = vector.load %arg5[%c28, %c0_97, %c0_98] : memref<32x16x64xf32, #tpu.memory_space<vmem>>, vector<1x16x64xf32>
    %154 = vector.shape_cast %153 : vector<1x16x64xf32> to vector<16x64xf32>
    %cst_99 = arith.constant dense<0.000000e+00> : vector<1x64xf32>
    %155 = tpu.matmul %152, %154, %cst_99 {dimension_numbers = #tpu.dot_dimension_numbers<[1], [0], [0], [1], [0, 0, 1, 1], [], []>} : vector<1x16xf32>, vector<16x64xf32>, vector<1x64xf32> -> vector<1x64xf32>
    %156 = arith.addf %151, %155 : vector<1x64xf32>
    %157 = vector.extract_strided_slice %10 {offsets = [29, 0], sizes = [1, 16], strides = [1, 1]} : vector<32x16xf32> to vector<1x16xf32>
    %c29 = arith.constant 29 : index
    %c0_100 = arith.constant 0 : index
    %c0_101 = arith.constant 0 : index
    %158 = vector.load %arg5[%c29, %c0_100, %c0_101] : memref<32x16x64xf32, #tpu.memory_space<vmem>>, vector<1x16x64xf32>
    %159 = vector.shape_cast %158 : vector<1x16x64xf32> to vector<16x64xf32>
    %cst_102 = arith.constant dense<0.000000e+00> : vector<1x64xf32>
    %160 = tpu.matmul %157, %159, %cst_102 {dimension_numbers = #tpu.dot_dimension_numbers<[1], [0], [0], [1], [0, 0, 1, 1], [], []>} : vector<1x16xf32>, vector<16x64xf32>, vector<1x64xf32> -> vector<1x64xf32>
    %161 = arith.addf %156, %160 : vector<1x64xf32>
    %162 = vector.extract_strided_slice %10 {offsets = [30, 0], sizes = [1, 16], strides = [1, 1]} : vector<32x16xf32> to vector<1x16xf32>
    %c30 = arith.constant 30 : index
    %c0_103 = arith.constant 0 : index
    %c0_104 = arith.constant 0 : index
    %163 = vector.load %arg5[%c30, %c0_103, %c0_104] : memref<32x16x64xf32, #tpu.memory_space<vmem>>, vector<1x16x64xf32>
    %164 = vector.shape_cast %163 : vector<1x16x64xf32> to vector<16x64xf32>
    %cst_105 = arith.constant dense<0.000000e+00> : vector<1x64xf32>
    %165 = tpu.matmul %162, %164, %cst_105 {dimension_numbers = #tpu.dot_dimension_numbers<[1], [0], [0], [1], [0, 0, 1, 1], [], []>} : vector<1x16xf32>, vector<16x64xf32>, vector<1x64xf32> -> vector<1x64xf32>
    %166 = arith.addf %161, %165 : vector<1x64xf32>
    %167 = vector.extract_strided_slice %10 {offsets = [31, 0], sizes = [1, 16], strides = [1, 1]} : vector<32x16xf32> to vector<1x16xf32>
    %c31 = arith.constant 31 : index
    %c0_106 = arith.constant 0 : index
    %c0_107 = arith.constant 0 : index
    %168 = vector.load %arg5[%c31, %c0_106, %c0_107] : memref<32x16x64xf32, #tpu.memory_space<vmem>>, vector<1x16x64xf32>
    %169 = vector.shape_cast %168 : vector<1x16x64xf32> to vector<16x64xf32>
    %cst_108 = arith.constant dense<0.000000e+00> : vector<1x64xf32>
    %170 = tpu.matmul %167, %169, %cst_108 {dimension_numbers = #tpu.dot_dimension_numbers<[1], [0], [0], [1], [0, 0, 1, 1], [], []>} : vector<1x16xf32>, vector<16x64xf32>, vector<1x64xf32> -> vector<1x64xf32>
    %171 = arith.addf %166, %170 : vector<1x64xf32>
    %cst_109 = arith.constant 0.000000e+00 : f32
    %172 = vector.broadcast %cst_109 : f32 to vector<1x64xf32>
    %173 = arith.maximumf %171, %172 : vector<1x64xf32>
    %c0_110 = arith.constant 0 : index
    %c0_111 = arith.constant 0 : index
    %174 = vector.load %arg7[%c0_110, %c0_111] : memref<64x10xf32, #tpu.memory_space<vmem>>, vector<64x10xf32>
    %cst_112 = arith.constant dense<0.000000e+00> : vector<1x10xf32>
    %175 = tpu.matmul %173, %174, %cst_112 {dimension_numbers = #tpu.dot_dimension_numbers<[1], [0], [0], [1], [0, 0, 1, 1], [], []>} : vector<1x64xf32>, vector<64x10xf32>, vector<1x10xf32> -> vector<1x10xf32>
    %c0_113 = arith.constant 0 : index
    %c0_114 = arith.constant 0 : index
    %176 = vector.load %arg8[%c0_113, %c0_114] : memref<1x10xf32, #tpu.memory_space<vmem>>, vector<1x10xf32>
    %177 = arith.addf %175, %176 : vector<1x10xf32>
    %c0_115 = arith.constant 0 : index
    %c0_116 = arith.constant 0 : index
    %c0_117 = arith.constant 0 : index
    %178 = vector.load %arg9[%c0_115, %c0_116, %c0_117] : memref<1x1x10xf32, #tpu.memory_space<vmem>>, vector<1x1x10xf32>
    %179 = vector.shape_cast %178 : vector<1x1x10xf32> to vector<1x10xf32>
    %180 = vector.shape_cast %177 : vector<1x10xf32> to vector<1x1x10xf32>
    tpu.vector_store %arg9[%c0_115, %c0_116, %c0_117], %180 {strides = array<i32>} : memref<1x1x10xf32, #tpu.memory_space<vmem>>, vector<1x1x10xf32>,
    return
  }
  func.func @transform_0(%arg0: i32) -> (i32, i32, i32) {
    %c0_i32 = arith.constant 0 : i32
    %c0_i32_0 = arith.constant 0 : i32
    %c0_i32_1 = arith.constant 0 : i32
    return %arg0, %c0_i32, %c0_i32_0 : i32, i32, i32
  }
  func.func @transform_1(%arg0: i32) -> (i32, i32) {
    %c0_i32 = arith.constant 0 : i32
    %c0_i32_0 = arith.constant 0 : i32
    %c0_i32_1 = arith.constant 0 : i32
    return %c0_i32, %c0_i32_0 : i32, i32
  }
  func.func @transform_2(%arg0: i32) -> (i32, i32) {
    %c0_i32 = arith.constant 0 : i32
    %c0_i32_0 = arith.constant 0 : i32
    %c0_i32_1 = arith.constant 0 : i32
    return %c0_i32, %c0_i32_0 : i32, i32
  }
  func.func @transform_3(%arg0: i32) -> (i32, i32) {
    %c0_i32 = arith.constant 0 : i32
    %c0_i32_0 = arith.constant 0 : i32
    %c0_i32_1 = arith.constant 0 : i32
    return %c0_i32, %c0_i32_0 : i32, i32
  }
  func.func @transform_4(%arg0: i32) -> (i32, i32, i32) {
    %c0_i32 = arith.constant 0 : i32
    %c0_i32_0 = arith.constant 0 : i32
    %c0_i32_1 = arith.constant 0 : i32
    %c0_i32_2 = arith.constant 0 : i32
    return %c0_i32, %c0_i32_0, %c0_i32_1 : i32, i32, i32
  }
  func.func @transform_5(%arg0: i32) -> (i32, i32) {
    %c0_i32 = arith.constant 0 : i32
    %c0_i32_0 = arith.constant 0 : i32
    %c0_i32_1 = arith.constant 0 : i32
    return %c0_i32, %c0_i32_0 : i32, i32
  }
  func.func @transform_6(%arg0: i32) -> (i32, i32) {
    %c0_i32 = arith.constant 0 : i32
    %c0_i32_0 = arith.constant 0 : i32
    %c0_i32_1 = arith.constant 0 : i32
    return %c0_i32, %c0_i32_0 : i32, i32
  }
  func.func @transform_7(%arg0: i32) -> (i32, i32) {
    %c0_i32 = arith.constant 0 : i32
    %c0_i32_0 = arith.constant 0 : i32
    %c0_i32_1 = arith.constant 0 : i32
    return %c0_i32, %c0_i32_0 : i32, i32
  }
  func.func @transform_8(%arg0: i32) -> (i32, i32, i32) {
    %c0_i32 = arith.constant 0 : i32
    %c0_i32_0 = arith.constant 0 : i32
    %c0_i32_1 = arith.constant 0 : i32
    return %arg0, %c0_i32, %c0_i32_0 : i32, i32, i32
  }
}

</mosaic_0001>

<bundles_post_ra>
// kernel: simple_model_forward.1
= control target key start
LH: loop header
LB: loop body
LE: loop exit
PB: predicated region body
PF: predicated region fallthrough
CT: control target
= control target key end

     0   :  { %13 = vsyncpa [#allocation3], 0  ;;  %s4700_s0 = inlined_call_operand.vmem [shape: f32[2,27,256], index: 0, kind: input, shape index: {}]   ;;  %s4701_s1 = inlined_call_operand.vmem [shape: f32[32,27], index: 1, kind: input, shape index: {}]   ;;  %s4702_s2 = inlined_call_operand.vmem [shape: f32[32,1], index: 2, kind: input, shape index: {}]   ;;  %s4703_s3 = inlined_call_operand.vmem [shape: f32[256,16], index: 3, kind: input, shape index: {}]   ;;  %s4704_s4 = inlined_call_operand.vmem [shape: f32[32,16,64], index: 4, kind: input, shape index: {}]   ;;  %s4705_s5 = inlined_call_operand.vmem [shape: f32[1,64], index: 5, kind: input, shape index: {}]   ;;  %s4706_s6 = inlined_call_operand.vmem [shape: f32[64,10], index: 6, kind: input, shape index: {}]   ;;  %s4707_s7 = inlined_call_operand.vmem [shape: f32[1,10], index: 7, kind: input, shape index: {}]   ;;  %s4708_s8 = inlined_call_operand.hbm [shape: f32[2,1,10], index: 8, kind: output, shape index: {}]  }
   0x1   :  { %15 = vsyncpa [#allocation3 + $0x1], 0  ;;  %s4068_s27 = smov 0   ;;  %s4070_s28 = smov 0  }
   0x2   :  { %s4072_s29 = smov 0   ;;  %s4074_s30 = smov 0  }
   0x3 LB: > { %s4089_s9 = sadd.s32 4294967295, %s4015_s30   ;;  %s3192_s10 = sadd.s32 4294967294, %s4015_s30   ;;  %s4015_s30 = sphi %s4074_s30, %s4716_s30   ;;  %s4011_s29 = sphi %s4072_s29, %s4715_s29   ;;  %s4007_s28 = sphi %s4070_s28, %s4714_s28   ;;  %s4003_s27 = sphi %s4068_s27, %s4713_s27  }
   0x4   : > { %s4093_s11 = sadd.s32 1, %s4015_s30   ;;  %s201_s12 = sadd.s32 1, %s4011_s29 }
   0x5   : > { %s198_s13 = ssub.s32 %s4015_s30, %s4093_s11  ;;  %p211_p0 = scmp.ne.s32.totalorder %s4011_s29, %s4007_s28 }
   0x6   : > { %p199_p1 = scmp.eq.s32.totalorder %s198_s13, 0  ;;  %p212_p2 = scmp.eq.s32.totalorder %s4089_s9, 1 }
   0x7   : > { %p217_p3 = scmp.ne.s32.totalorder %s4007_s28, %s4003_s27  ;;  %p218_p4 = scmp.eq.s32.totalorder %s3192_s10, 1 }
   0x8   : > { %s4104_s14 = scalar_select %p199_p1, %s4011_s29, %s201_s12  }
   0x9   : > { %p4106_p5 = por %p212_p2, %p211_p0  ;;  %p4110_p6 = por %p218_p4, %p217_p3 }
   0xa   : > { %p3195_p7 = scmp.ge.s32.totalorder %s4015_s30, 1  ;;  %p265_p8 = scmp.lt.s32.totalorder %s4015_s30, 3 }
   0xc   : > { %p266_p9 = pnand %p3195_p7, %p265_p8 }
   0xd   : > { %p298_p10 = scmp.lt.s32.totalorder (!%p266_p9), %s4089_s9, 1  ;;  %v4017_v0 = vmov (!%p266_p9), 0.0   ;;  %vm352_vm0 = vcmask (!%p266_p9), 1042432   ;;  %v4018_v1 = vmov (!%p266_p9), 0   ;;  %v315_v2 = vld [vmem:[%s4702_s2] sm:$0xff] (!%p266_p9)  ;;  %v317_v3 = vld [vmem:[%s4702_s2 + $0x10] sm:$0xff] (!%p266_p9) }
   0xe   : > { %269 = sbr.rel (%p266_p9) target bundleno = 1107 (0x453), region = 52  ;;  %423 = vmatprep.mubr.f32.mxu1 (!%p266_p9), %v4017_v0  ;;  %3951 = vset.pattern.permute.xlu0 (!%p266_p9), %v4018_v1  ;;  %v316_v4 = vld [vmem:[%s4702_s2 + $0x8] sm:$0xff] (!%p266_p9)  ;;  %vm4019_vm1 = vmmov (!%p266_p9), 1   ;;  %v318_v6 = vld [vmem:[%s4702_s2 + $0x18] sm:$0xff] (!%p266_p9)  ;;  %v472_v10 = vld [vmem:[%s4703_s3 + $0x80] sm:$0xff] (!%p266_p9)  ;;  %vm339_vm3 = vcmask (!%p266_p9), 220160  }
   0xf   : > { %3952 = vset.pattern.permute.xlu1 (!%p266_p9), %v4018_v1  ;;  %321 = vperm.xlu0 (!%p266_p9), %3951, %v315_v2   ;;  %vm4131_vm2 = vmpackc.low (!%p266_p9), %vm352_vm0, %vm4019_vm1  ;;  %v473_v19 = vld [vmem:[%s4703_s3 + $0x88] sm:$0xff] (!%p266_p9)  ;;  %v456_v22 = vld [vmem:[%s4703_s3] sm:$0xff] (!%p266_p9)  ;;  %vm4021_vm4 = vmmov (!%p266_p9), 0   ;;  %vm576_vm5 = vcmask (!%p266_p9), 130048   ;;  %vm3048_vm6 = vcmask (!%p266_p9), 523264   ;;  %vm3122_vm7 = vcmask (!%p266_p9), 73728  }
  0x10   : > { %331 = vperm.xlu1 (!%p266_p9), %3952, %v317_v3   ;;  %v3705_v21 = vpack.c.bf16 (!%p266_p9), %v473_v19, %v472_v10  ;;  %v457_v23 = vld [vmem:[%s4703_s3 + $0x8] sm:$0xff] (!%p266_p9)  ;;  %v474_v24 = vld [vmem:[%s4703_s3 + $0x90] sm:$0xff] (!%p266_p9)  ;;  %v475_v25 = vld [vmem:[%s4703_s3 + $0x98] sm:$0xff] (!%p266_p9)  ;;  %3505 = vmatprep.mubr.msk.f32.mxu0 (!%p266_p9), %vm4021_vm4, %v4017_v0 }
  0x11   : > { %v311_v26 = vld [vmem:[%s4701_s1] sm:$0xff] (!%p266_p9)  ;;  %v3707_v27 = vpack.c.bf16 (!%p266_p9), %v457_v23, %v456_v22  ;;  %v3709_v28 = vpack.c.bf16 (!%p266_p9), %v475_v25, %v474_v24  ;;  %v458_v29 = vld [vmem:[%s4703_s3 + $0x10] sm:$0xff] (!%p266_p9)  ;;  %v459_v30 = vld [vmem:[%s4703_s3 + $0x18] sm:$0xff] (!%p266_p9) }
  0x12   : > { %v476_v31 = vld [vmem:[%s4703_s3 + $0xa0] sm:$0xff] (!%p266_p9)  ;;  %v477_v32 = vld [vmem:[%s4703_s3 + $0xa8] sm:$0xff] (!%p266_p9)  ;;  %v3711_v34 = vpack.c.bf16 (!%p266_p9), %v459_v30, %v458_v29  ;;  %v478_v38 = vld [vmem:[%s4703_s3 + $0xb0] sm:$0xff] (!%p266_p9) }
  0x13   : > { %326 = vperm.xlu0 (!%p266_p9), %3951, %v316_v4   ;;  %v312_v33 = vld [vmem:[%s4701_s1 + $0x8] sm:$0xff] (!%p266_p9)  ;;  %v3713_v35 = vpack.c.bf16 (!%p266_p9), %v477_v32, %v476_v31  ;;  %v460_v36 = vld [vmem:[%s4703_s3 + $0x20] sm:$0xff] (!%p266_p9)  ;;  %v479_v39 = vld [vmem:[%s4703_s3 + $0xb8] sm:$0xff] (!%p266_p9) }
  0x14   : > { %336 = vperm.xlu1 (!%p266_p9), %3952, %v318_v6   ;;  %v461_v37 = vld [vmem:[%s4703_s3 + $0x28] sm:$0xff] (!%p266_p9)  ;;  %v313_v40 = vld [vmem:[%s4701_s1 + $0x10] sm:$0xff] (!%p266_p9)  ;;  %v3717_v42 = vpack.c.bf16 (!%p266_p9), %v479_v39, %v478_v38  ;;  %v463_v44 = vld [vmem:[%s4703_s3 + $0x38] sm:$0xff] (!%p266_p9)  ;;  %v4020_v39 = vmov (!%p266_p9), 0.0|0.0  }
  0x15   : > { %s299_s17 = scalar_select %p298_p10, %s4089_s9, 1  ;;  %v3715_v41 = vpack.c.bf16 %v461_v37, %v460_v36  ;;  %v462_v43 = vld [vmem:[%s4703_s3 + $0x30] sm:$0xff]  ;;  %v480_v45 = vld [vmem:[%s4703_s3 + $0xc0] sm:$0xff]  ;;  %v481_v46 = vld [vmem:[%s4703_s3 + $0xc8] sm:$0xff]  ;;  %3758 = vmatprep.subr.bf16.mxu0 %v4020_v39 }
  0x16   : > { %v314_v47 = vld [vmem:[%s4701_s1 + $0x18] sm:$0xff]  ;;  %v3719_v48 = vpack.c.bf16 %v463_v44, %v462_v43  ;;  %v3721_v49 = vpack.c.bf16 %v481_v46, %v480_v45  ;;  %v464_v50 = vld [vmem:[%s4703_s3 + $0x40] sm:$0xff]  ;;  %v465_v51 = vld [vmem:[%s4703_s3 + $0x48] sm:$0xff] }
  0x17   : > { %s3302_s22 = sshll.u32 %s299_s17, 6  ;;  %v482_v52 = vld [vmem:[%s4703_s3 + $0xd0] sm:$0xff]  ;;  %v483_v53 = vld [vmem:[%s4703_s3 + $0xd8] sm:$0xff]  ;;  %v3723_v54 = vpack.c.bf16 %v465_v51, %v464_v50  ;;  %v484_v58 = vld [vmem:[%s4703_s3 + $0xe0] sm:$0xff]  ;;  %s3299_s17 = sshll.u32 %s4089_s9, 4 }
  0x18   : > { %s302_s10 = scalar_lea.vmem %s4700_s0, %s3302_s22  ;;  %v3725_v55 = vpack.c.bf16 %v483_v53, %v482_v52  ;;  %v466_v56 = vld [vmem:[%s4703_s3 + $0x50] sm:$0xff]  ;;  %v467_v57 = vld [vmem:[%s4703_s3 + $0x58] sm:$0xff]  ;;  %v485_v59 = vld [vmem:[%s4703_s3 + $0xe8] sm:$0xff]  ;;  %s4658_s22 = scalar_lea.hbm %s4708_s8, %s3299_s17 }
  0x19   : > { %v304_v7 = vld [vmem:[%s302_s10 + $0x8] sm:$0xff]  ;;  %v306_v8 = vld [vmem:[%s302_s10 + $0x18] sm:$0xff]  ;;  %v303_v9 = vld [vmem:[%s302_s10] sm:$0xff]  ;;  %v3727_v60 = vpack.c.bf16 %v467_v57, %v466_v56  ;;  %v3729_v61 = vpack.c.bf16 %v485_v59, %v484_v58  ;;  %s4022_s9 = smov [#allocation2]  }
  0x1a   : > { %v3695_v11 = vpack.c.bf16 %v306_v8, %v304_v7  ;;  %v305_v12 = vld [vmem:[%s302_s10 + $0x10] sm:$0xff]  ;;  %v308_v13 = vld [vmem:[%s302_s10 + $0x28] sm:$0xff]  ;;  %v310_v14 = vld [vmem:[%s302_s10 + $0x38] sm:$0x7]  ;;  %s3957_s25 = sshll.u32 %s4022_s9, 4  ;;  %s3958_s25 = int_to_ptr.vmem [resolvable:$false] %s3957_s25 }
  0x1b   : > { %v3697_v15 = vpack.c.bf16 %v305_v12, %v303_v9  ;;  %v3699_v16 = vpack.c.bf16 %v310_v14, %v308_v13  ;;  %v307_v17 = vld [vmem:[%s302_s10 + $0x20] sm:$0xff]  ;;  %v309_v18 = vld [vmem:[%s302_s10 + $0x30] sm:$0x7]  ;;  %v469_v63 = vld [vmem:[%s4703_s3 + $0x68] sm:$0xff]  ;;  %s296_s10 = sand.u32 1, %s4007_s28   ;;  %s3959_s26 = scalar_lea.vmem %s3958_s25, 32 }
  0x1c   : > { %3696 = vmatprep.subr.bf16.mxu1 %v3695_v11  ;;  %v3702_v20 = vpack.c.bf16 %v309_v18, %v307_v17  ;;  %v468_v62 = vld [vmem:[%s4703_s3 + $0x60] sm:$0xff]  ;;  %v486_v2 = vld [vmem:[%s4703_s3 + $0xf0] sm:$0xff]  ;;  %v487_v3 = vld [vmem:[%s4703_s3 + $0xf8] sm:$0xff]  ;;  %s297_s18 = scalar_lea.vmem [#allocation2], %s296_s10  ;;  %s3125_s23 = scalar_lea.sflag [#allocation3], %s296_s10 }
  0x1d   : > { %3698 = vmatpush1.bf16.msra.mxu1 %v3697_v15  ;;  %v3731_v1 = vpack.c.bf16 %v469_v63, %v468_v62  ;;  %v3733_v4 = vpack.c.bf16 %v487_v3, %v486_v2  ;;  %v470_v5 = vld [vmem:[%s4703_s3 + $0x70] sm:$0xff]  ;;  %v471_v6 = vld [vmem:[%s4703_s3 + $0x78] sm:$0xff]  ;;  %v574_v36 = vld [vmem:[%s4704_s4] sm:$0xff]  ;;  %s3137_s19 = sshll.u32 %s297_s18, 4  ;;  %s4660_s19 = int_to_ptr.vmem [resolvable:$true] %s3137_s19 }
  0x1e   : > { %3701 = vmatprep.subr.msk.bf16.mxu1 %vm4131_vm2, %v3699_v16  ;;  %v3735_v7 = vpack.c.bf16 %v471_v6, %v470_v5  ;;  %v575_v37 = vld [vmem:[%s4704_s4 + $0x8] sm:$0xff]  ;;  %v3205_v43 = vld [vmem:[%s4704_s4 + $0x10] sm:$0xff]  ;;  %v3206_v44 = vld [vmem:[%s4704_s4 + $0x18] sm:$0xff]  ;;  %s3953_s24 = scalar_lea.vmem %s4660_s19, 16  ;;  %p3960_p0 = scmp.lt.s32.totalorder %s4660_s19, %s3958_s25 }
  0x1f   : > { %v3738_v38 = vpack.c.bf16 %v575_v37, %v574_v36  ;;  %v3226_v46 = vld [vmem:[%s4704_s4 + $0x80] sm:$0xff]  ;;  %v3209_v57 = vld [vmem:[%s4704_s4 + $0x28] sm:$0xff]  ;;  %v3229_v58 = vld [vmem:[%s4704_s4 + $0x90] sm:$0xff]  ;;  %p3954_p11 = scmp.ne.s32.totalorder %s4660_s19, %s3953_s24  ;;  %p3961_p1 = scmp.lt.s32.totalorder %s3959_s26, %s3953_s24 }
  0x20   : > { %v3208_v56 = vld [vmem:[%s4704_s4 + $0x20] sm:$0xff]  ;;  %v3230_v59 = vld [vmem:[%s4704_s4 + $0x98] sm:$0xff]  ;;  %v3211_v5 = vld [vmem:[%s4704_s4 + $0x30] sm:$0xff] }
  0x21   : > { %3704 = vmatpush1.bf16.msk.msra.mxu1 %vm4131_vm2, %v3702_v20  ;;  %v3765_v2 = vpack.c.bf16 %v3230_v59, %v3229_v58  ;;  %v3212_v6 = vld [vmem:[%s4704_s4 + $0x38] sm:$0xff]  ;;  %v3259_v59 = vld [vmem:[%s4704_s4 + $0x130] sm:$0xff]  ;;  %p3955_p12 = pnand %p3954_p11, %p4106_p5  ;;  %p3962_p2 = por %p3961_p1, %p3960_p0 }
  0x22   : > { %3706 = vmatprep.subr.bf16.mxu1 %v3705_v21 }
  0x23   : > { %p3956_p13 = pneg %p3955_p12 }
  0x24   : > { %3200 = vmatmul.mubr.msk.f32.vlgmr.msra.gmra.mrb[0].mxu1 %vm339_vm3, %v311_v26 }
  0x25   : > { %429 = vmatprep.mubr.f32.mxu1 %v4017_v0  ;;  %3708 = vmatpush3.bf16.msra.mxu1 %v3707_v27  ;;  %p3963_p3 = pnand %p3962_p2, %p3956_p13 }
  0x26   : > { %3710 = vmatprep.subr.bf16.mxu1 %v3709_v28 }
  0x28   : > { %3201 = vmatmul.mubr.msk.f32.gmra.mrb[2].mxu1 %vm339_vm3, %v312_v33 }
  0x29   : > { %435 = vmatprep.mubr.f32.mxu1 %v4017_v0  ;;  %3712 = vmatpush3.bf16.msra.mxu1 %v3711_v34 }
  0x2a   : > { %3714 = vmatprep.subr.bf16.mxu1 %v3713_v35 }
  0x2c   : > { %3202 = vmatmul.mubr.msk.f32.gmra.mrb[4].mxu1 %vm339_vm3, %v313_v40  ;;  %v3223_v40 = vld [vmem:[%s4704_s4 + $0x70] sm:$0xff] }
  0x2d   : > { %441 = vmatprep.mubr.f32.mxu1 %v4017_v0  ;;  %3716 = vmatpush3.bf16.msra.mxu1 %v3715_v41  ;;  %v3224_v41 = vld [vmem:[%s4704_s4 + $0x78] sm:$0xff] }
  0x2e   : > { %3718 = vmatprep.subr.bf16.mxu1 %v3717_v42  ;;  %v3759_v42 = vpack.c.bf16 %v3224_v41, %v3223_v40  ;;  %v3245_v40 = vld [vmem:[%s4704_s4 + $0xe8] sm:$0xff] }
  0x30   : > { %3203 = vmatmul.mubr.msk.f32.gmra.mrb[6].mxu1 %vm339_vm3, %v314_v47  ;;  %3760 = vmatpush3.bf16.msra.mxu0 %v3759_v42  ;;  %v3227_v47 = vld [vmem:[%s4704_s4 + $0x88] sm:$0xff] }
  0x31   : > { %3720 = vmatpush3.bf16.msra.mxu1 %v3719_v48  ;;  %3761 = vmatprep.subr.bf16.mxu0 %v4020_v39  ;;  %v3762_v51 = vpack.c.bf16 %v3227_v47, %v3226_v46 }
  0x32   : > { %3722 = vmatprep.subr.bf16.mxu1 %v3721_v49  ;;  %v3741_v49 = vpack.c.bf16 %v3206_v44, %v3205_v43  ;;  %v3247_v44 = vld [vmem:[%s4704_s4 + $0xf0] sm:$0xff] }
  0x35   : > { %3724 = vmatpush3.bf16.msra.mxu1 %v3723_v54 }
  0x36   : > { %3726 = vmatprep.subr.bf16.mxu1 %v3725_v55 }
  0x39   : > { %3728 = vmatpush3.bf16.msra.mxu1 %v3727_v60 }
  0x3a   : > { %3730 = vmatprep.subr.bf16.mxu1 %v3729_v61  ;;  %v3744_v61 = vpack.c.bf16 %v3209_v57, %v3208_v56  ;;  %v3257_v56 = vld [vmem:[%s4704_s4 + $0x128] sm:$0xff] }
  0x3d   : > { %3732 = vmatpush3.bf16.msra.mxu1 %v3731_v1 }
  0x3e   : > { %3734 = vmatprep.subr.bf16.mxu1 %v3733_v4 }
  0x41   : > { %3736 = vmatpush3.bf16.msra.mxu1 %v3735_v7 }
  0x42   : > { %3737 = vmatprep.subr.bf16.mxu1 %v4020_v39 }
  0x8e   : > { %v322_v8 = vpop.permute.xlu0 %321 }
  0x8f   : > { %v332_v13 = vpop.permute.xlu1 %331 }
  0x92   : > { %v327_v14 = vpop.permute.xlu0 %326 }
  0x93   : > { %v337_v27 = vpop.permute.xlu1 %336 }
  0xf7   : > { %v425_v9 = vpop.f32.mrb[0].mxu1 }
  0xf8   : > { %v426_v10 = vadd.f32 %v425_v9, %v322_v8  ;;  %v427_v11 = vpop.f32.mrb[1].mxu1  ;;  %v3233_v9 = vld [vmem:[%s4704_s4 + $0xa8] sm:$0xff] }
  0xf9   : > { %v428_v12 = vadd.f32 %v427_v11, %v322_v8  ;;  %v3232_v8 = vld [vmem:[%s4704_s4 + $0xa0] sm:$0xff] }
  0xfa   : > { %v448_v17 = vmax.f32 %v426_v10, 0.0  ;;  %v3747_v10 = vpack.c.bf16 %v3212_v6, %v3211_v5  ;;  %v3265_v5 = vld [vmem:[%s4704_s4 + $0x150] sm:$0xff]  ;;  %v3266_v6 = vld [vmem:[%s4704_s4 + $0x158] sm:$0xff] }
  0xfb   : > { %v449_v15 = vmax.f32 %v428_v12, 0.0  ;;  %v431_v16 = vpop.f32.mrb[2].mxu1  ;;  %v3768_v12 = vpack.c.bf16 %v3233_v9, %v3232_v8  ;;  %v3801_v8 = vpack.c.bf16 %v3266_v6, %v3265_v5  ;;  %v3047_v5 = vld [vmem:[%s4707_s7] sm:$0x1] }
  0xfc   : > { %v432_v18 = vadd.f32 %v431_v16, %v327_v14  ;;  %v433_v19 = vpop.f32.mrb[3].mxu1  ;;  %v3235_v16 = vld [vmem:[%s4704_s4 + $0xb0] sm:$0xff] }
  0xfd   : > { %v434_v20 = vadd.f32 %v433_v19, %v327_v14  ;;  %552 = vmatprep.mubr.f32.mxu1 %v449_v15  ;;  %v3214_v14 = vld [vmem:[%s4704_s4 + $0x40] sm:$0xff]  ;;  %v3215_v15 = vld [vmem:[%s4704_s4 + $0x48] sm:$0xff] }
  0xfe   : > { %553 = vmatmul.mubr.f32.vlgmr.msra.gmra.mrb[8].mxu1 %v448_v17  ;;  %v450_v23 = vmax.f32 %v432_v18, 0.0  ;;  %v3236_v17 = vld [vmem:[%s4704_s4 + $0xb8] sm:$0xff]  ;;  %v3750_v18 = vpack.c.bf16 %v3215_v15, %v3214_v14  ;;  %v3271_v14 = vld [vmem:[%s4704_s4 + $0x170] sm:$0xff] }
  0xff   : > { %v451_v21 = vmax.f32 %v434_v20, 0.0  ;;  %v437_v22 = vpop.f32.mrb[4].mxu1  ;;  %3739 = vmatpush3.bf16.msra.mxu1 %v3738_v38  ;;  %v3771_v20 = vpack.c.bf16 %v3236_v17, %v3235_v16  ;;  %v3244_v38 = vld [vmem:[%s4704_s4 + $0xe0] sm:$0xff]  ;;  %v3272_v15 = vld [vmem:[%s4704_s4 + $0x178] sm:$0xff] }
 0x100   : > { %v438_v24 = vadd.f32 %v437_v22, %v332_v13  ;;  %v439_v25 = vpop.f32.mrb[5].mxu1  ;;  %3740 = vmatprep.subr.bf16.mxu1 %v4020_v39  ;;  %v3217_v22 = vld [vmem:[%s4704_s4 + $0x50] sm:$0xff]  ;;  %v3780_v42 = vpack.c.bf16 %v3245_v40, %v3244_v38  ;;  %v3807_v16 = vpack.c.bf16 %v3272_v15, %v3271_v14  ;;  %v3284_v38 = vld [vmem:[%s4704_s4 + $0x1b8] sm:$0xff] }
 0x101   : > { %557 = vmatprep.mubr.f32.mxu1 %v451_v21  ;;  %v440_v26 = vadd.f32 %v439_v25, %v332_v13  ;;  %v3239_v25 = vld [vmem:[%s4704_s4 + $0xc8] sm:$0xff] }
 0x102   : > { %558 = vmatmul.mubr.f32.gmra.mrb[10].mxu1 %v450_v23  ;;  %v452_v28 = vmax.f32 %v438_v24, 0.0  ;;  %v3218_v23 = vld [vmem:[%s4704_s4 + $0x58] sm:$0xff]  ;;  %v3238_v24 = vld [vmem:[%s4704_s4 + $0xc0] sm:$0xff] }
 0x103   : > { %v453_v29 = vmax.f32 %v440_v26, 0.0  ;;  %v443_v30 = vpop.f32.mrb[6].mxu1  ;;  %v3753_v26 = vpack.c.bf16 %v3218_v23, %v3217_v22  ;;  %v3277_v22 = vld [vmem:[%s4704_s4 + $0x190] sm:$0xff]  ;;  %v3278_v23 = vld [vmem:[%s4704_s4 + $0x198] sm:$0xff] }
 0x104   : > { %v444_v31 = vadd.f32 %v443_v30, %v337_v27  ;;  %v445_v32 = vpop.f32.mrb[7].mxu1  ;;  %v3220_v30 = vld [vmem:[%s4704_s4 + $0x60] sm:$0xff] }
 0x105   : > { %v446_v33 = vadd.f32 %v445_v32, %v337_v27  ;;  %562 = vmatprep.mubr.f32.mxu1 %v453_v29  ;;  %v3241_v32 = vld [vmem:[%s4704_s4 + $0xd0] sm:$0xff] }
 0x106   : > { %v454_v34 = vmax.f32 %v444_v31, 0.0  ;;  %563 = vmatmul.mubr.f32.gmra.mrb[12].mxu1 %v452_v28  ;;  %v3774_v28 = vpack.c.bf16 %v3239_v25, %v3238_v24  ;;  %v3221_v31 = vld [vmem:[%s4704_s4 + $0x68] sm:$0xff] }
 0x107   : > { %v455_v35 = vmax.f32 %v446_v33, 0.0  ;;  %v3242_v33 = vld [vmem:[%s4704_s4 + $0xd8] sm:$0xff]  ;;  %v3040_v24 = vld [vmem:[%s4706_s6 + $0x8] sm:$0xff] }
 0x108   : > { %v3777_v36 = vpack.c.bf16 %v3242_v33, %v3241_v32  ;;  %v3280_v32 = vld [vmem:[%s4704_s4 + $0x1a0] sm:$0xff]  ;;  %v3281_v33 = vld [vmem:[%s4704_s4 + $0x1a8] sm:$0xff] }
 0x109   : > { %567 = vmatprep.mubr.f32.mxu1 %v455_v35 }
 0x10a   : > { %568 = vmatmul.mubr.f32.gmra.mrb[14].mxu1 %v454_v34  ;;  %v3756_v34 = vpack.c.bf16 %v3221_v31, %v3220_v30  ;;  %v3043_v30 = vld [vmem:[%s4706_s6 + $0x20] sm:$0xff]  ;;  %v3044_v31 = vld [vmem:[%s4706_s6 + $0x28] sm:$0xff] }
 0x10b   : > { %3456 = vmatprep.mubr.msk.f32.mxu1 %vm4021_vm4, %v4017_v0 }
 0x1d1   : > { %v3335_v45 = vpop.f32.mrb[8].mxu1 }
 0x1d2   : > { %v3336_v48 = vpop.f32.mrb[9].mxu1 }
 0x1d3   : > { %v4289_v50 = vadd.f32 %v3336_v48, %v3335_v45  ;;  %v3248_v45 = vld [vmem:[%s4704_s4 + $0xf8] sm:$0xff]  ;;  %v3250_v48 = vld [vmem:[%s4704_s4 + $0x100] sm:$0xff] }
 0x1d4   : > { %v3783_v46 = vpack.c.bf16 %v3248_v45, %v3247_v44 }
 0x1d5   : > { %v3338_v52 = vpop.f32.mrb[10].mxu1  ;;  %3457 = vmatmul.mubr.msk.f32.vlgmr.msra.gmra.mrb[16].mxu1 %vm576_vm5, %v4289_v50  ;;  %v1116_v53 = vrot.slane %v4289_v50, 7  ;;  %v654_v63 = vrot.slane %v4289_v50, 1  ;;  %v731_v11 = vrot.slane %v4289_v50, 2  ;;  %v808_v19 = vrot.slane %v4289_v50, 3 }
 0x1d6   : > { %v3339_v54 = vpop.f32.mrb[11].mxu1  ;;  %3742 = vmatpush3.bf16.msra.mxu1 %v3741_v49  ;;  %3463 = vmatprep.mubr.msk.f32.mxu1 %vm4021_vm4, %v4017_v0  ;;  %v885_v27 = vrot.slane %v4289_v50, 4  ;;  %v962_v35 = vrot.slane %v4289_v50, 5  ;;  %v1039_v41 = vrot.slane %v4289_v50, 6  ;;  %v3251_v49 = vld [vmem:[%s4704_s4 + $0x108] sm:$0xff] }
 0x1d7   : > { %v4296_v55 = vadd.f32 %v3339_v54, %v3338_v52  ;;  %3506 = vmatmul.mubr.msk.f32.vlgmr.msra.gmra.mrb[0].mxu0 %vm576_vm5, %v1116_v53  ;;  %3743 = vmatprep.subr.bf16.mxu1 %v4020_v39  ;;  %v3786_v50 = vpack.c.bf16 %v3251_v49, %v3250_v48  ;;  %v3253_v52 = vld [vmem:[%s4704_s4 + $0x110] sm:$0xff]  ;;  %v3254_v53 = vld [vmem:[%s4704_s4 + $0x118] sm:$0xff] }
 0x1d8   : > { %3763 = vmatpush3.bf16.msra.mxu0 %v3762_v51  ;;  %3512 = vmatprep.mubr.msk.f32.mxu0 %vm4021_vm4, %v4017_v0  ;;  %v3789_v54 = vpack.c.bf16 %v3254_v53, %v3253_v52 }
 0x1d9   : > { %3764 = vmatprep.subr.bf16.mxu0 %v4020_v39  ;;  %v3341_v60 = vpop.f32.mrb[12].mxu1  ;;  %v1270_v13 = vrot.slane %v4296_v55, 1  ;;  %v1347_v21 = vrot.slane %v4296_v55, 2  ;;  %v1424_v29 = vrot.slane %v4296_v55, 3  ;;  %v1501_v37 = vrot.slane %v4296_v55, 4 }
 0x1da   : > { %v3342_v62 = vpop.f32.mrb[13].mxu1  ;;  %v1578_v43 = vrot.slane %v4296_v55, 5  ;;  %v1655_v47 = vrot.slane %v4296_v55, 6  ;;  %v1732_v51 = vrot.slane %v4296_v55, 7 }
 0x1db   : > { %v4316_v1 = vadd.f32 %v3342_v62, %v3341_v60  ;;  %v3260_v60 = vld [vmem:[%s4704_s4 + $0x138] sm:$0xff] }
 0x1dd   : > { %3464 = vmatmul.mubr.msk.f32.vlgmr.msra.gmra.mrb[16].mxu1 %vm576_vm5, %v654_v63  ;;  %v3344_v3 = vpop.f32.mrb[14].mxu1  ;;  %v1886_v58 = vrot.slane %v4316_v1, 1  ;;  %v1963_v62 = vrot.slane %v4316_v1, 2  ;;  %v3262_v63 = vld [vmem:[%s4704_s4 + $0x140] sm:$0xff]  ;;  %v2117_v9 = vrot.slane %v4316_v1, 4  ;;  %v2271_v17 = vrot.slane %v4316_v1, 6 }
 0x1de   : > { %3745 = vmatpush3.bf16.msra.mxu1 %v3744_v61  ;;  %3470 = vmatprep.mubr.msk.f32.mxu1 %vm4021_vm4, %v4017_v0  ;;  %v3345_v4 = vpop.f32.mrb[15].mxu1  ;;  %v3795_v61 = vpack.c.bf16 %v3260_v60, %v3259_v59  ;;  %v3045_v60 = vld [vmem:[%s4706_s6 + $0x30] sm:$0xff] }
 0x1df   : > { %3513 = vmatmul.mubr.msk.f32.vlgmr.msra.gmra.mrb[0].mxu0 %vm576_vm5, %v4296_v55  ;;  %3746 = vmatprep.subr.bf16.mxu1 %v4020_v39  ;;  %v4330_v7 = vadd.f32 %v3345_v4, %v3344_v3  ;;  %v3256_v55 = vld [vmem:[%s4704_s4 + $0x120] sm:$0xff]  ;;  %v2040_v4 = vrot.slane %v4316_v1, 3 }
 0x1e0   : > { %3766 = vmatpush3.bf16.msra.mxu0 %v3765_v2  ;;  %3519 = vmatprep.mubr.msk.f32.mxu0 %vm4021_vm4, %v4017_v0  ;;  %v3792_v57 = vpack.c.bf16 %v3257_v56, %v3256_v55  ;;  %v3263_v2 = vld [vmem:[%s4704_s4 + $0x148] sm:$0xff]  ;;  %v3296_v55 = vld [vmem:[%s4704_s4 + $0x1f8] sm:$0xff] }
 0x1e1   : > { %3767 = vmatprep.subr.bf16.mxu0 %v4020_v39  ;;  %v3798_v3 = vpack.c.bf16 %v3263_v2, %v3262_v63  ;;  %v2656_v45 = vrot.slane %v4330_v7, 3  ;;  %v2733_v49 = vrot.slane %v4330_v7, 4  ;;  %v2810_v53 = vrot.slane %v4330_v7, 5 }
 0x1e5   : > { %3471 = vmatmul.mubr.msk.f32.vlgmr.msra.gmra.mrb[16].mxu1 %vm576_vm5, %v731_v11  ;;  %v3269_v11 = vld [vmem:[%s4704_s4 + $0x168] sm:$0xff] }
 0x1e6   : > { %3748 = vmatpush3.bf16.msra.mxu1 %v3747_v10  ;;  %3477 = vmatprep.mubr.msk.f32.mxu1 %vm4021_vm4, %v4017_v0  ;;  %v3268_v10 = vld [vmem:[%s4704_s4 + $0x160] sm:$0xff] }
 0x1e7   : > { %3520 = vmatmul.mubr.msk.f32.vlgmr.msra.gmra.mrb[0].mxu0 %vm576_vm5, %v1270_v13  ;;  %3749 = vmatprep.subr.bf16.mxu1 %v4020_v39  ;;  %v2194_v13 = vrot.slane %v4316_v1, 5 }
 0x1e8   : > { %3769 = vmatpush3.bf16.msra.mxu0 %v3768_v12  ;;  %3526 = vmatprep.mubr.msk.f32.mxu0 %vm4021_vm4, %v4017_v0  ;;  %v3804_v12 = vpack.c.bf16 %v3269_v11, %v3268_v10 }
 0x1e9   : > { %3770 = vmatprep.subr.bf16.mxu0 %v4020_v39 }
 0x1ed   : > { %3478 = vmatmul.mubr.msk.f32.vlgmr.msra.gmra.mrb[16].mxu1 %vm576_vm5, %v808_v19  ;;  %v3275_v19 = vld [vmem:[%s4704_s4 + $0x188] sm:$0xff] }
 0x1ee   : > { %3751 = vmatpush3.bf16.msra.mxu1 %v3750_v18  ;;  %3484 = vmatprep.mubr.msk.f32.mxu1 %vm4021_vm4, %v4017_v0  ;;  %v3274_v18 = vld [vmem:[%s4704_s4 + $0x180] sm:$0xff] }
 0x1ef   : > { %3527 = vmatmul.mubr.msk.f32.vlgmr.msra.gmra.mrb[0].mxu0 %vm576_vm5, %v1347_v21  ;;  %3752 = vmatprep.subr.bf16.mxu1 %v4020_v39  ;;  %v2348_v21 = vrot.slane %v4316_v1, 7 }
 0x1f0   : > { %3772 = vmatpush3.bf16.msra.mxu0 %v3771_v20  ;;  %3533 = vmatprep.mubr.msk.f32.mxu0 %vm4021_vm4, %v4017_v0  ;;  %v3810_v20 = vpack.c.bf16 %v3275_v19, %v3274_v18 }
 0x1f1   : > { %3773 = vmatprep.subr.bf16.mxu0 %v4020_v39 }
 0x1f5   : > { %3485 = vmatmul.mubr.msk.f32.vlgmr.msra.gmra.mrb[16].mxu1 %vm576_vm5, %v885_v27  ;;  %v3042_v27 = vld [vmem:[%s4706_s6 + $0x18] sm:$0xff] }
 0x1f6   : > { %3754 = vmatpush3.bf16.msra.mxu1 %v3753_v26  ;;  %3491 = vmatprep.mubr.msk.f32.mxu1 %vm4021_vm4, %v4017_v0  ;;  %v3041_v26 = vld [vmem:[%s4706_s6 + $0x10] sm:$0xff] }
 0x1f7   : > { %3534 = vmatmul.mubr.msk.f32.vlgmr.msra.gmra.mrb[0].mxu0 %vm576_vm5, %v1424_v29  ;;  %3755 = vmatprep.subr.bf16.mxu1 %v4020_v39  ;;  %v3837_v29 = vpack.c.bf16 %v3042_v27, %v3041_v26 }
 0x1f8   : > { %3775 = vmatpush3.bf16.msra.mxu0 %v3774_v28  ;;  %3540 = vmatprep.mubr.msk.f32.mxu0 %vm4021_vm4, %v4017_v0  ;;  %v3813_v28 = vpack.c.bf16 %v3278_v23, %v3277_v22 }
 0x1f9   : > { %3776 = vmatprep.subr.bf16.mxu0 %v4020_v39 }
 0x1fd   : > { %3492 = vmatmul.mubr.msk.f32.vlgmr.msra.gmra.mrb[16].mxu1 %vm576_vm5, %v962_v35  ;;  %v3816_v35 = vpack.c.bf16 %v3281_v33, %v3280_v32 }
 0x1fe   : > { %3757 = vmatpush3.bf16.msra.mxu1 %v3756_v34  ;;  %3498 = vmatprep.mubr.msk.f32.mxu1 %vm4021_vm4, %v4017_v0  ;;  %v3840_v34 = vpack.c.bf16 %v3044_v31, %v3043_v30 }
 0x1ff   : > { %3541 = vmatmul.mubr.msk.f32.vlgmr.msra.gmra.mrb[0].mxu0 %vm576_vm5, %v1501_v37  ;;  %3833 = vmatprep.subr.bf16.mxu1 %v4020_v39  ;;  %v3283_v37 = vld [vmem:[%s4704_s4 + $0x1b0] sm:$0xff] }
 0x200   : > { %3778 = vmatpush3.bf16.msra.mxu0 %v3777_v36  ;;  %3547 = vmatprep.mubr.msk.f32.mxu0 %vm4021_vm4, %v4017_v0  ;;  %v2502_v36 = vrot.slane %v4330_v7, 1  ;;  %v3819_v40 = vpack.c.bf16 %v3284_v38, %v3283_v37 }
 0x201   : > { %3779 = vmatprep.subr.bf16.mxu0 %v4020_v39 }
 0x205   : > { %3499 = vmatmul.mubr.msk.f32.vlgmr.msra.gmra.mrb[16].mxu1 %vm576_vm5, %v1039_v41  ;;  %v2579_v41 = vrot.slane %v4330_v7, 2 }
 0x206   : > { %3692 = vmatprep.mubr.msk.f32.mxu1 %vm4021_vm4, %v4017_v0 }
 0x207   : > { %3548 = vmatmul.mubr.msk.f32.vlgmr.msra.gmra.mrb[0].mxu0 %vm576_vm5, %v1578_v43  ;;  %v3287_v43 = vld [vmem:[%s4704_s4 + $0x1c8] sm:$0xff] }
 0x208   : > { %3781 = vmatpush3.bf16.msra.mxu0 %v3780_v42  ;;  %3554 = vmatprep.mubr.msk.f32.mxu0 %vm4021_vm4, %v4017_v0  ;;  %v3286_v42 = vld [vmem:[%s4704_s4 + $0x1c0] sm:$0xff] }
 0x209   : > { %3782 = vmatprep.subr.bf16.mxu0 %v4020_v39  ;;  %v3822_v44 = vpack.c.bf16 %v3287_v43, %v3286_v42 }
 0x20f   : > { %3555 = vmatmul.mubr.msk.f32.vlgmr.msra.gmra.mrb[0].mxu0 %vm576_vm5, %v1655_v47  ;;  %v3290_v47 = vld [vmem:[%s4704_s4 + $0x1d8] sm:$0xff] }
 0x210   : > { %3784 = vmatpush3.bf16.msra.mxu0 %v3783_v46  ;;  %3561 = vmatprep.mubr.msk.f32.mxu0 %vm4021_vm4, %v4017_v0  ;;  %v3289_v46 = vld [vmem:[%s4704_s4 + $0x1d0] sm:$0xff] }
 0x211   : > { %3785 = vmatprep.subr.bf16.mxu0 %v4020_v39  ;;  %v3825_v48 = vpack.c.bf16 %v3290_v47, %v3289_v46 }
 0x217   : > { %3562 = vmatmul.mubr.msk.f32.vlgmr.msra.gmra.mrb[0].mxu0 %vm576_vm5, %v1732_v51  ;;  %v3293_v51 = vld [vmem:[%s4704_s4 + $0x1e8] sm:$0xff] }
 0x218   : > { %3787 = vmatpush3.bf16.msra.mxu0 %v3786_v50  ;;  %3568 = vmatprep.mubr.msk.f32.mxu0 %vm4021_vm4, %v4017_v0  ;;  %v3292_v50 = vld [vmem:[%s4704_s4 + $0x1e0] sm:$0xff] }
 0x219   : > { %3788 = vmatprep.subr.bf16.mxu0 %v4020_v39  ;;  %v3828_v52 = vpack.c.bf16 %v3293_v51, %v3292_v50 }
 0x21f   : > { %3569 = vmatmul.mubr.msk.f32.vlgmr.msra.gmra.mrb[0].mxu0 %vm576_vm5, %v4316_v1  ;;  %v3039_v1 = vld [vmem:[%s4706_s6] sm:$0xff] }
 0x220   : > { %3790 = vmatpush3.bf16.msra.mxu0 %v3789_v54  ;;  %3575 = vmatprep.mubr.msk.f32.mxu0 %vm4021_vm4, %v4017_v0  ;;  %v3834_v25 = vpack.c.bf16 %v3040_v24, %v3039_v1  ;;  %v3295_v54 = vld [vmem:[%s4704_s4 + $0x1f0] sm:$0xff] }
 0x221   : > { %3791 = vmatprep.subr.bf16.mxu0 %v4020_v39  ;;  %v3831_v56 = vpack.c.bf16 %v3296_v55, %v3295_v54 }
 0x222   : > { %3835 = vmatpush3.bf16.msra.mxu1 %v3834_v25 }
 0x223   : > { %3836 = vmatprep.subr.bf16.mxu1 %v4020_v39 }
 0x226   : > { %3838 = vmatpush3.bf16.msra.mxu1 %v3837_v29 }
 0x227   : > { %3576 = vmatmul.mubr.msk.f32.vlgmr.msra.gmra.mrb[0].mxu0 %vm576_vm5, %v1886_v58  ;;  %3839 = vmatprep.subr.bf16.mxu1 %v4020_v39  ;;  %v2964_v58 = vrot.slane %v4330_v7, 7 }
 0x228   : > { %3793 = vmatpush3.bf16.msra.mxu0 %v3792_v57  ;;  %3582 = vmatprep.mubr.msk.f32.mxu0 %vm4021_vm4, %v4017_v0  ;;  %v2887_v57 = vrot.slane %v4330_v7, 6 }
 0x229   : > { %3794 = vmatprep.subr.bf16.mxu0 %v4020_v39 }
 0x22a   : > { %3841 = vmatpush3.bf16.msra.mxu1 %v3840_v34 }
 0x22b   : > { %3842 = vmatprep.subr.bf16.mxu1 %v4020_v39 }
 0x22f   : > { %3583 = vmatmul.mubr.msk.f32.vlgmr.msra.gmra.mrb[0].mxu0 %vm576_vm5, %v1963_v62 }
 0x230   : > { %3796 = vmatpush3.bf16.msra.mxu0 %v3795_v61  ;;  %3589 = vmatprep.mubr.msk.f32.mxu0 %vm4021_vm4, %v4017_v0  ;;  %v3046_v61 = vld [vmem:[%s4706_s6 + $0x38] sm:$0xff] }
 0x231   : > { %3797 = vmatprep.subr.bf16.mxu0 %v4020_v39  ;;  %v3843_v62 = vpack.c.bf16 %v3046_v61, %v3045_v60 }
 0x233   : > { %3844 = vmatpush3.bf16.msra.mxu1 %v3843_v62 }
 0x237   : > { %3590 = vmatmul.mubr.msk.f32.vlgmr.msra.gmra.mrb[0].mxu0 %vm576_vm5, %v2040_v4 }
 0x238   : > { %3799 = vmatpush3.bf16.msra.mxu0 %v3798_v3  ;;  %3596 = vmatprep.mubr.msk.f32.mxu0 %vm4021_vm4, %v4017_v0 }
 0x239   : > { %3800 = vmatprep.subr.bf16.mxu0 %v4020_v39 }
 0x23f   : > { %3597 = vmatmul.mubr.msk.f32.vlgmr.msra.gmra.mrb[0].mxu0 %vm576_vm5, %v2117_v9 }
 0x240   : > { %3802 = vmatpush3.bf16.msra.mxu0 %v3801_v8  ;;  %3603 = vmatprep.mubr.msk.f32.mxu0 %vm4021_vm4, %v4017_v0 }
 0x241   : > { %3803 = vmatprep.subr.bf16.mxu0 %v4020_v39 }
 0x247   : > { %3604 = vmatmul.mubr.msk.f32.vlgmr.msra.gmra.mrb[0].mxu0 %vm576_vm5, %v2194_v13 }
 0x248   : > { %3805 = vmatpush3.bf16.msra.mxu0 %v3804_v12  ;;  %3610 = vmatprep.mubr.msk.f32.mxu0 %vm4021_vm4, %v4017_v0 }
 0x249   : > { %3806 = vmatprep.subr.bf16.mxu0 %v4020_v39 }
 0x24f   : > { %3611 = vmatmul.mubr.msk.f32.vlgmr.msra.gmra.mrb[0].mxu0 %vm576_vm5, %v2271_v17 }
 0x250   : > { %3808 = vmatpush3.bf16.msra.mxu0 %v3807_v16  ;;  %3617 = vmatprep.mubr.msk.f32.mxu0 %vm4021_vm4, %v4017_v0 }
 0x251   : > { %3809 = vmatprep.subr.bf16.mxu0 %v4020_v39 }
 0x257   : > { %3618 = vmatmul.mubr.msk.f32.vlgmr.msra.gmra.mrb[0].mxu0 %vm576_vm5, %v2348_v21 }
 0x258   : > { %3811 = vmatpush3.bf16.msra.mxu0 %v3810_v20  ;;  %3624 = vmatprep.mubr.msk.f32.mxu0 %vm4021_vm4, %v4017_v0 }
 0x259   : > { %3812 = vmatprep.subr.bf16.mxu0 %v4020_v39 }
 0x25f   : > { %3625 = vmatmul.mubr.msk.f32.vlgmr.msra.gmra.mrb[0].mxu0 %vm576_vm5, %v4330_v7 }
 0x260   : > { %3814 = vmatpush3.bf16.msra.mxu0 %v3813_v28  ;;  %3631 = vmatprep.mubr.msk.f32.mxu0 %vm4021_vm4, %v4017_v0 }
 0x261   : > { %3815 = vmatprep.subr.bf16.mxu0 %v4020_v39 }
 0x267   : > { %3632 = vmatmul.mubr.msk.f32.vlgmr.msra.gmra.mrb[0].mxu0 %vm576_vm5, %v2502_v36 }
 0x268   : > { %3817 = vmatpush3.bf16.msra.mxu0 %v3816_v35  ;;  %3638 = vmatprep.mubr.msk.f32.mxu0 %vm4021_vm4, %v4017_v0 }
 0x269   : > { %3818 = vmatprep.subr.bf16.mxu0 %v4020_v39 }
 0x26f   : > { %3639 = vmatmul.mubr.msk.f32.vlgmr.msra.gmra.mrb[0].mxu0 %vm576_vm5, %v2579_v41 }
 0x270   : > { %3820 = vmatpush3.bf16.msra.mxu0 %v3819_v40  ;;  %3645 = vmatprep.mubr.msk.f32.mxu0 %vm4021_vm4, %v4017_v0 }
 0x271   : > { %3821 = vmatprep.subr.bf16.mxu0 %v4020_v39 }
 0x277   : > { %3646 = vmatmul.mubr.msk.f32.vlgmr.msra.gmra.mrb[0].mxu0 %vm576_vm5, %v2656_v45 }
 0x278   : > { %3823 = vmatpush3.bf16.msra.mxu0 %v3822_v44  ;;  %3652 = vmatprep.mubr.msk.f32.mxu0 %vm4021_vm4, %v4017_v0 }
 0x279   : > { %3824 = vmatprep.subr.bf16.mxu0 %v4020_v39 }
 0x27f   : > { %3653 = vmatmul.mubr.msk.f32.vlgmr.msra.gmra.mrb[0].mxu0 %vm576_vm5, %v2733_v49 }
 0x280   : > { %3826 = vmatpush3.bf16.msra.mxu0 %v3825_v48  ;;  %3659 = vmatprep.mubr.msk.f32.mxu0 %vm4021_vm4, %v4017_v0 }
 0x281   : > { %3827 = vmatprep.subr.bf16.mxu0 %v4020_v39 }
 0x287   : > { %3660 = vmatmul.mubr.msk.f32.vlgmr.msra.gmra.mrb[0].mxu0 %vm576_vm5, %v2810_v53 }
 0x288   : > { %3829 = vmatpush3.bf16.msra.mxu0 %v3828_v52  ;;  %3666 = vmatprep.mubr.msk.f32.mxu0 %vm4021_vm4, %v4017_v0 }
 0x289   : > { %3830 = vmatprep.subr.bf16.mxu0 %v4020_v39 }
 0x28f   : > { %3667 = vmatmul.mubr.msk.f32.vlgmr.msra.gmra.mrb[0].mxu0 %vm576_vm5, %v2887_v57 }
 0x290   : > { %3832 = vmatpush3.bf16.msra.mxu0 %v3831_v56  ;;  %3673 = vmatprep.mubr.msk.f32.mxu0 %vm4021_vm4, %v4017_v0  ;;  %v573_v0 = vld [vmem:[%s4705_s5] sm:$0x1] }
 0x297   : > { %3674 = vmatmul.mubr.msk.f32.vlgmr.msra.gmra.mrb[0].mxu0 %vm576_vm5, %v2964_v58 }
 0x2d8   : > { %v1108_v39 = vpop.f32.mrb[16].mxu1 }
 0x2d9   : > { %v3500_v59 = vpop.f32.mrb[17].mxu1  ;;  %v3845_v7 = vadd.f32 %v1108_v39, %v573_v0 }
 0x36a   : > { %v3033_v63 = vpop.f32.mrb[0].mxu0 }
 0x36b   : > { %v3846_v2 = vadd.f32 %v3845_v7, %v3033_v63  ;;  %v3675_v3 = vpop.f32.mrb[1].mxu0 }
 0x36d   : > { %v3038_v4 = vmax.f32 %v3846_v2, 0.0 }
 0x36f   : > { %3693 = vmatmul.mubr.msk.f32.vlgmr.msra.gmra.mrb[18].mxu1 %vm3048_vm6, %v3038_v4 }
 0x442   : > { %v3118_v6 = vpop.f32.mrb[18].mxu1 }
 0x443   : > { %v3119_v8 = vadd.f32 %v3118_v6, %v3047_v5  ;;  %v3694_v9 = vpop.f32.mrb[19].mxu1 }
 0x445   : > { %3123 = vst.msk [vmem:[%s297_s18] sm:$0x1] %vm3122_vm7, %v3119_v8 }
 0x446   : > { %3966 = shalt.err (!%p3963_p3)
}
 0x447   : > { %s3967_s10 = scalar_lea.hbm %s4658_s22, 16  ;;  %s3971_s17 = scalar_lea.hbm %s4708_s8, 32 }
 0x448   : > { %p3968_p4 = scmp.ne.s32.totalorder %s4658_s22, %s3967_s10  ;;  %p3972_p9 = scmp.lt.u32.totalorder %s4658_s22, %s4708_s8 }
 0x449   : > { %p3973_p10 = scmp.lt.u32.totalorder %s3971_s17, %s3967_s10  ;;  %p3975_p12 = scmp.lt.u32.totalorder %s3967_s10, %s4658_s22 }
 0x44a   : > { %p3969_p7 = pnand %p3968_p4, %p4106_p5 }
 0x44b   : > { %p3974_p11 = por %p3973_p10, %p3972_p9 }
 0x44c   : > { %p3970_p8 = pneg %p3969_p7 }
 0x44d   : > { %p3976_p13 = por %p3975_p12, %p3974_p11 }
 0x44f   : > { %p3977_p0 = pnand %p3976_p13, %p3970_p8 }
 0x451   : > { %3980 = shalt.err (!%p3977_p0)
}
 0x452   : > { %3907 = dma.vmem_to_hbm [thread:$0]  (%p4106_p5), %s4660_s19, 16, %s4658_s22, %s3125_s23  }
 0x453 PF: > { %p3913_p1 = scmp.ge.s32.totalorder %s4015_s30, 2  ;;  %s3149_s21 = sand.u32 1, %s4003_s27  }
 0x454   : > { %s3150_s24 = scalar_lea.sflag [#allocation3], %s3149_s21 }
 0x455   : > { %p3910_p2 = pnand %p3913_p1, %p4110_p6 }
 0x457   : > { %3998 = dma.done.wait (!%p3910_p2), %s3150_s24, 16  }
 0x458   : > { %4000 = vsyncadd (!%p3910_p2), %s3150_s24, 4294967280  ;;  %p18_p3 = scmp.ge.s32.totalorder %s4093_s11, 4   ;;  %s4713_s27 = smov %s4007_s28 }
 0x459   : > { %s4714_s28 = smov %s4011_s29  ;;  %s4715_s29 = smov %s4104_s14 }
 0x45a   : > { %s4716_s30 = smov %s4093_s11  ;;  %20 = sbr.rel (!%p18_p3) target bundleno = 3 (0x3), region = 118 }
 0x461   :  { %3154 = vsyncpa [#allocation3], 1 }
 0x462   :  { %3156 = vsyncpa [#allocation3 + $0x1], 1 }

</bundles_post_ra>
